<compile_context>
chip_gen: v7x
topology: tpu7x:2x2x1
jax: 0.10.0
libtpu: 0.0.40
codegen_flags: <defaults>
</compile_context>

<pallas_src>
import functools
import math

import jax
import jax.numpy as jnp
from jax.experimental import pallas as pl
from jax.experimental.pallas import tpu as pltpu


def _dilated_mha_kernel(x_ref, wqkv_ref, wo_ref, bqkv_ref, bo_ref, o_ref,
                        o_scratch, *, num_heads, dilation_rate, segment_size,
                        out_scale):
    """One block of Nt segments: fused-QKV MHA for all R dilation branches.

    x_ref:     (B, Nt*S, R*D)  in dtype  branch r lives in columns r*D:(r+1)*D
    wqkv_ref:  (R, D, 3D)      bf16      fused [Wq/sqrt(dh) | Wk | Wv]
    wo_ref:    (R, D, D)       bf16
    bqkv_ref:  (R, 1, 3D)      f32       fused [bq/sqrt(dh) | bk | bv]
    bo_ref:    (R, 1, D)       f32
    o_ref:     (B, Nt*S, R*D)  bf16
    o_scratch: (B*Nt*S, D)     bf16      per-head outputs assembled here
    """
    B, rows, RD = x_ref.shape
    R, S = dilation_rate, segment_size
    D = RD // R
    dh = D // num_heads
    Nt = rows // S
    M = B * Nt

    for r in range(R):
        # Branch gather = static lane slice of the fused block (no host
        # transpose); cast to bf16 for the MXU.
        xr = x_ref[:, :, r * D:(r + 1) * D].astype(jnp.bfloat16)
        xr = xr.reshape(M * S, D)

        # Single fused QKV projection, f32 accumulation; the 1/sqrt(dh) scale
        # is already folded into Wq/bq on the host.
        qkv = jnp.dot(xr, wqkv_ref[r], preferred_element_type=jnp.float32)
        qkv = (qkv + bqkv_ref[r]).astype(jnp.bfloat16)

        # Per-head attention, each op batched over all B*Nt segments at once
        # (single leading batch dim -> reliable Mosaic lowering).
        # TODO(synk): for >=8 heads switch to lax.fori_loop with pl.ds column
        #             offsets to bound vreg live ranges / code size.
        # TODO(synk): if dh is not a multiple of 128 these column slices incur
        #             relayout copies; pad dh or process 2 heads per slice.
        for h in range(num_heads):
            qh = qkv[:, h * dh:(h + 1) * dh].reshape(M, S, dh)
            kh = qkv[:, D + h * dh:D + (h + 1) * dh].reshape(M, S, dh)
            vh = qkv[:, 2 * D + h * dh:2 * D + (h + 1) * dh].reshape(M, S, dh)

            s = jnp.einsum('bqd,bkd->bqk', qh, kh,
                           preferred_element_type=jnp.float32)
            s = s - jnp.max(s, axis=-1, keepdims=True)
            p = jnp.exp(s)                              # f32, un-normalized
            inv = pl.reciprocal(jnp.sum(p, axis=-1, keepdims=True),
                                approx=True)            # EUP slot

            # Normalize AFTER the PV matmul: dh-wide rows instead of S-wide,
            # and the division happens in f32 after accumulation.
            oh = jnp.einsum('bqk,bkd->bqd', p.astype(jnp.bfloat16), vh,
                            preferred_element_type=jnp.float32)
            oh = oh * inv
            o_scratch[:, h * dh:(h + 1) * dh] = (
                oh.reshape(M * S, dh).astype(jnp.bfloat16))

        # Single output projection over the assembled heads; 1/R branch weight
        # (softmax of uniform logits) folded into the store.
        out = jnp.dot(o_scratch[...], wo_ref[r],
                      preferred_element_type=jnp.float32)
        out = (out + bo_ref[r]) * out_scale
        o_ref[:, :, r * D:(r + 1) * D] = (
            out.reshape(B, rows, D).astype(o_ref.dtype))


def _vmem_capacity_bytes():
    try:
        return int(pltpu.get_tpu_info().vmem_capacity_bytes)
    except Exception:
        return 128 * 1024 * 1024   # v5e/v6e physical VMEM


def _estimate_vmem_bytes(block_segments, *, batch, segment_size, dilation_rate,
                         d_model, num_heads):
    """Rough per-grid-step VMEM footprint (double-buffered I/O + temporaries)."""
    B, S, R, D = batch, segment_size, dilation_rate, d_model
    Nt = block_segments
    rows = B * Nt * S
    M = B * Nt
    dh = D // num_heads
    b = 0
    b += 2 * rows * R * D * 4                    # x block (f32), double-buffered
    b += 2 * rows * R * D * 2                    # out block (bf16), double-buffered
    b += 2 * (R * D * 3 * D + R * D * D) * 2     # bf16 weights (assume 2 buffers)
    b += rows * D * 2                            # head-assembly scratch (bf16)
    b += rows * 3 * D * (4 + 2)                  # qkv f32 + bf16 copy
    b += 3 * M * S * S * 4                       # scores / exp / probs (f32)
    b += M * S * dh * 4                          # per-head PV accumulator (f32)
    return b


def _pick_block_segments(num_segments, vmem_budget, **dims):
    """Largest divisor Nt of N whose estimated footprint fits `vmem_budget`,
    preferring tilings that leave >= 2 grid steps so a 2-TC chip (v7x) can
    split the parallel axis."""
    N = num_segments
    S = dims['segment_size']

    def aligned(nt):   # (8,128) rule on the rows axis of the block
        return (nt * S) % 8 == 0 or nt == N

    cands = [nt for nt in range(1, N + 1) if N % nt == 0 and aligned(nt)]
    fitting = [nt for nt in cands
               if _estimate_vmem_bytes(nt, **dims) <= vmem_budget]
    if not fitting:
        # Even the smallest aligned tile exceeds the budget.
        # TODO(synk): kv-tiled online softmax for this regime.
        return cands[0]
    multi_step = [nt for nt in fitting if N // nt >= 2]
    return max(multi_step) if multi_step else max(fitting)


def dilated_attention(x, params, *, dilation_rate, segment_size, num_heads,
                      block_segments=None):
    """Pallas implementation of DilatedAttention.forward (module defaults)."""
    B, L, D = x.shape
    R, S = dilation_rate, segment_size
    assert L % R == 0 and (L // R) % S == 0, "seq_len must split into segments"
    assert D % num_heads == 0
    N = (L // R) // S
    dh = D // num_heads
    wq, wk, wv, wo, bq, bk, bv, bo = params

    # Host-side prep (weights only; x needs no gather/cast pass at all):
    # fold 1/sqrt(dh) into Wq AND bq, fuse QKV weights & biases, cast to bf16.
    inv_sqrt_dh = 1.0 / math.sqrt(dh)
    wqkv = jnp.concatenate([wq * inv_sqrt_dh, wk, wv],
                           axis=-1).astype(jnp.bfloat16)        # (R, D, 3D)
    bqkv = jnp.concatenate([bq * inv_sqrt_dh, bk, bv],
                           axis=-1).astype(jnp.float32)         # (R, 1, 3D)
    wo_b = wo.astype(jnp.bfloat16)                              # (R, D, D)
    bo_b = bo.astype(jnp.float32)                               # (R, 1, D)

    # Zero-copy view: row k of the (N*S) axis holds the R interleaved branch
    # columns for branch position k (global position k*R + r lives in columns
    # r*D:(r+1)*D).  Replaces the previous host-side gather transpose.
    x3 = x.reshape(B, N * S, R * D)

    vmem_cap = _vmem_capacity_bytes()
    vmem_limit = max(32 * 1024 * 1024, (vmem_cap * 3) // 4)   # headroom vs physical
    dims = dict(batch=B, segment_size=S, dilation_rate=R, d_model=D,
                num_heads=num_heads)
    if block_segments is None:
        block_segments = _pick_block_segments(N, (vmem_limit * 4) // 5, **dims)
    Nt = block_segments
    assert N % Nt == 0
    rows = Nt * S
    assert rows % 8 == 0 or Nt == N, "Nt*segment_size must be a multiple of 8"

    kernel = functools.partial(_dilated_mha_kernel, num_heads=num_heads,
                               dilation_rate=R, segment_size=S,
                               out_scale=1.0 / R)   # softmax([c]*R) == 1/R
    const_spec = lambda n: (0, 0, 0)                # weights resident across grid
    out = pl.pallas_call(
        kernel,
        out_shape=jax.ShapeDtypeStruct((B, N * S, R * D), jnp.bfloat16),
        grid_spec=pltpu.PrefetchScalarGridSpec(
            num_scalar_prefetch=0,
            grid=(N // Nt,),
            in_specs=[
                pl.BlockSpec((B, rows, R * D), lambda n: (0, n, 0)),
                pl.BlockSpec((R, D, 3 * D), const_spec),
                pl.BlockSpec((R, D, D), const_spec),
                pl.BlockSpec((R, 1, 3 * D), const_spec),
                pl.BlockSpec((R, 1, D), const_spec),
            ],
            out_specs=pl.BlockSpec((B, rows, R * D), lambda n: (0, n, 0)),
            scratch_shapes=[pltpu.VMEM((B * Nt * S, D), jnp.bfloat16)],
        ),
        compiler_params=pltpu.CompilerParams(
            dimension_semantics=("parallel",),
            vmem_limit_bytes=int(vmem_limit),
        ),
    )(x3, wqkv, wo_b, bqkv, bo_b)

    # Zero-copy scatter back: (B, N*S, R*D) -> (B, L, D); branch outputs land
    # at positions r::R (disjoint), weighting already done in-kernel.
    return out.reshape(B, L, D)


def _reference(x, params, *, dilation_rate, segment_size, num_heads):
    """Pure-JAX f32 re-implementation of the PyTorch forward (defaults only)."""
    B, L, D = x.shape
    R, S = dilation_rate, segment_size
    wq, wk, wv, wo, bq, bk, bv, bo = params
    dh = D // num_heads
    branch_outs = []
    for r in range(R):
        xr = x[:, r::R, :]
        Lr = xr.shape[1]
        N = Lr // S
        xr = xr.reshape(B, N, S, D)
        segs = []
        for n in range(N):
            e = xr[:, n]
            q = e @ wq[r] + bq[r]
            k = e @ wk[r] + bk[r]
            v = e @ wv[r] + bv[r]
            hs = []
            for h in range(num_heads):
                sl = slice(h * dh, (h + 1) * dh)
                s = jnp.einsum('bqd,bkd->bqk', q[..., sl], k[..., sl]) / math.sqrt(dh)
                p = jax.nn.softmax(s, axis=-1)
                hs.append(jnp.einsum('bqk,bkd->bqd', p, v[..., sl]))
            segs.append(jnp.concatenate(hs, axis=-1) @ wo[r] + bo[r])
        branch = jnp.concatenate(segs, axis=1)
        resized = jnp.zeros((B, L, D), jnp.float32).at[:, r::R, :].set(branch)
        branch_outs.append(resized)
    w = jax.nn.softmax(jnp.full((R,), 1.0 / R, dtype=jnp.float32))
    return sum(wi * o for wi, o in zip(w, branch_outs))


def _init_params(key, d_model, dilation_rate):
    """One FlashMHA-style (Wq, Wk, Wv, Wo + biases) per dilation branch."""
    R, D = dilation_rate, d_model
    ks = jax.random.split(key, 8)
    scale = 0.02
    wq = scale * jax.random.normal(ks[0], (R, D, D), jnp.float32)
    wk = scale * jax.random.normal(ks[1], (R, D, D), jnp.float32)
    wv = scale * jax.random.normal(ks[2], (R, D, D), jnp.float32)
    wo = scale * jax.random.normal(ks[3], (R, D, D), jnp.float32)
    bq = scale * jax.random.normal(ks[4], (R, 1, D), jnp.float32)
    bk = scale * jax.random.normal(ks[5], (R, 1, D), jnp.float32)
    bv = scale * jax.random.normal(ks[6], (R, 1, D), jnp.float32)
    bo = scale * jax.random.normal(ks[7], (R, 1, D), jnp.float32)
    return (wq, wk, wv, wo, bq, bk, bv, bo)


if __name__ == "__main__":
    # Small shapes: d_model=32, num_heads=4, dilation_rate=2, segment_size=8,
    # batch=2, seq_len=32 -> per-branch subsequence 16 = 2 segments of 8.
    B, L, D = 2, 32, 32
    num_heads, dilation_rate, segment_size = 4, 2, 8

    key = jax.random.PRNGKey(0)
    kx, kp = jax.random.split(key)
    x = jax.random.normal(kx, (B, L, D), jnp.float32)
    params = _init_params(kp, D, dilation_rate)

    out = dilated_attention(x, params,
                            dilation_rate=dilation_rate,
                            segment_size=segment_size,
                            num_heads=num_heads)
    out = jax.block_until_ready(out)

    ref = _reference(x, params,
                     dilation_rate=dilation_rate,
                     segment_size=segment_size,
                     num_heads=num_heads)
    assert out.shape == (B, L, D)
    # bf16 matmul inputs/outputs (f32 accumulation) -> relaxed tolerance vs f32.
    assert jnp.allclose(out.astype(jnp.float32), ref, rtol=2e-2, atol=2e-2)
    print("KERNEL_OK")
</pallas_src>

<mosaic_0001>
module attributes {stable_mosaic.version = 11 : i64} {
  func.func @_dilated_mha_kernel(%arg0: i32, %arg1: memref<2x8x64xf32, #tpu.memory_space<vmem>>, %arg2: memref<2x32x96xbf16, #tpu.memory_space<vmem>>, %arg3: memref<2x32x32xbf16, #tpu.memory_space<vmem>>, %arg4: memref<2x1x96xf32, #tpu.memory_space<vmem>>, %arg5: memref<2x1x32xf32, #tpu.memory_space<vmem>>, %arg6: memref<2x8x64xbf16, #tpu.memory_space<vmem>>, %arg7: memref<16x32xbf16, #tpu.memory_space<vmem>>) attributes {dimension_semantics = [#tpu.dimension_semantics<parallel>], iteration_bounds = array<i64: 2>, scalar_prefetch = 0 : i64, scratch_operands = 1 : i64, tpu.core_type = #tpu.core_type<tc>, window_params = [{transform_indices = @transform_0, window_bounds = array<i64: 2, 8, 64>}, {pipeline_mode = #tpu.pipeline_mode<synchronous>, transform_indices = @transform_1, window_bounds = array<i64: 2, 32, 96>}, {pipeline_mode = #tpu.pipeline_mode<synchronous>, transform_indices = @transform_2, window_bounds = array<i64: 2, 32, 32>}, {pipeline_mode = #tpu.pipeline_mode<synchronous>, transform_indices = @transform_3, window_bounds = array<i64: 2, 1, 96>}, {pipeline_mode = #tpu.pipeline_mode<synchronous>, transform_indices = @transform_4, window_bounds = array<i64: 2, 1, 32>}, {transform_indices = @transform_5, window_bounds = array<i64: 2, 8, 64>}]} {
    %c0 = arith.constant 0 : index
    %c0_0 = arith.constant 0 : index
    %c0_1 = arith.constant 0 : index
    %0 = vector.load %arg1[%c0, %c0_0, %c0_1] : memref<2x8x64xf32, #tpu.memory_space<vmem>>, vector<2x8x32xf32>
    %1 = arith.truncf %0 : vector<2x8x32xf32> to vector<2x8x32xbf16>
    %2 = vector.shape_cast %1 : vector<2x8x32xbf16> to vector<16x32xbf16>
    %c0_2 = arith.constant 0 : index
    %c0_3 = arith.constant 0 : index
    %c0_4 = arith.constant 0 : index
    %3 = vector.load %arg2[%c0_2, %c0_3, %c0_4] : memref<2x32x96xbf16, #tpu.memory_space<vmem>>, vector<1x32x96xbf16>
    %4 = vector.shape_cast %3 : vector<1x32x96xbf16> to vector<32x96xbf16>
    %cst = arith.constant dense<0.000000e+00> : vector<16x96xf32>
    %5 = tpu.matmul %2, %4, %cst {dimension_numbers = #tpu.dot_dimension_numbers<[1], [0], [0], [1], [0, 0, 1, 1], [], []>} : vector<16x32xbf16>, vector<32x96xbf16>, vector<16x96xf32> -> vector<16x96xf32>
    %c0_5 = arith.constant 0 : index
    %c0_6 = arith.constant 0 : index
    %c0_7 = arith.constant 0 : index
    %6 = vector.load %arg4[%c0_5, %c0_6, %c0_7] : memref<2x1x96xf32, #tpu.memory_space<vmem>>, vector<1x1x96xf32>
    %7 = vector.shape_cast %6 : vector<1x1x96xf32> to vector<1x96xf32>
    %8 = vector.broadcast %7 : vector<1x96xf32> to vector<16x96xf32>
    %9 = arith.addf %5, %8 : vector<16x96xf32>
    %10 = arith.truncf %9 : vector<16x96xf32> to vector<16x96xbf16>
    %11 = vector.extract_strided_slice %10 {offsets = [0, 0], sizes = [16, 8], strides = [1, 1]} : vector<16x96xbf16> to vector<16x8xbf16>
    %12 = vector.shape_cast %11 : vector<16x8xbf16> to vector<2x8x8xbf16>
    %13 = vector.extract_strided_slice %10 {offsets = [0, 32], sizes = [16, 8], strides = [1, 1]} : vector<16x96xbf16> to vector<16x8xbf16>
    %14 = vector.shape_cast %13 : vector<16x8xbf16> to vector<2x8x8xbf16>
    %15 = vector.extract_strided_slice %10 {offsets = [0, 64], sizes = [16, 8], strides = [1, 1]} : vector<16x96xbf16> to vector<16x8xbf16>
    %16 = vector.shape_cast %15 : vector<16x8xbf16> to vector<2x8x8xbf16>
    "tpu.trace_start"() <{level = 10 : i32, message = "bqd,bkd->bqk"}> : () -> ()
    %cst_8 = arith.constant dense<0.000000e+00> : vector<2x8x8xf32>
    %17 = tpu.matmul %12, %14, %cst_8 {dimension_numbers = #tpu.dot_dimension_numbers<[2], [2], [1], [1], [0, 0, 0, 1, 1, 1], [0], [0]>} : vector<2x8x8xbf16>, vector<2x8x8xbf16>, vector<2x8x8xf32> -> vector<2x8x8xf32>
    "tpu.trace_stop"() : () -> ()
    %cst_9 = arith.constant dense<0xFF800000> : vector<2x8xf32>
    %18 = vector.multi_reduction <maximumf>, %17, %cst_9 [2] : vector<2x8x8xf32> to vector<2x8xf32>
    %19 = vector.shape_cast %18 : vector<2x8xf32> to vector<2x8x1xf32>
    %20 = vector.broadcast %19 : vector<2x8x1xf32> to vector<2x8x8xf32>
    %21 = arith.subf %17, %20 : vector<2x8x8xf32>
    %22 = math.exp %21 : vector<2x8x8xf32>
    %cst_10 = arith.constant dense<0.000000e+00> : vector<2x8xf32>
    %23 = vector.multi_reduction <add>, %22, %cst_10 [2] : vector<2x8x8xf32> to vector<2x8xf32>
    %24 = vector.shape_cast %23 : vector<2x8xf32> to vector<2x8x1xf32>
    %25 = tpu.reciprocal %24 {approx = true} : vector<2x8x1xf32> -> vector<2x8x1xf32>
    %26 = arith.truncf %22 : vector<2x8x8xf32> to vector<2x8x8xbf16>
    "tpu.trace_start"() <{level = 10 : i32, message = "bqk,bkd->bqd"}> : () -> ()
    %cst_11 = arith.constant dense<0.000000e+00> : vector<2x8x8xf32>
    %27 = tpu.matmul %26, %16, %cst_11 {dimension_numbers = #tpu.dot_dimension_numbers<[2], [1], [1], [2], [0, 0, 0, 1, 1, 2], [0], [0]>} : vector<2x8x8xbf16>, vector<2x8x8xbf16>, vector<2x8x8xf32> -> vector<2x8x8xf32>
    "tpu.trace_stop"() : () -> ()
    %28 = vector.broadcast %25 : vector<2x8x1xf32> to vector<2x8x8xf32>
    %29 = arith.mulf %27, %28 : vector<2x8x8xf32>
    %30 = vector.shape_cast %29 : vector<2x8x8xf32> to vector<16x8xf32>
    %31 = arith.truncf %30 : vector<16x8xf32> to vector<16x8xbf16>
    %c0_12 = arith.constant 0 : index
    %c0_13 = arith.constant 0 : index
    %32 = vector.load %arg7[%c0_12, %c0_13] : memref<16x32xbf16, #tpu.memory_space<vmem>>, vector<16x8xbf16>
    tpu.vector_store %arg7[%c0_12, %c0_13], %31 {strides = array<i32>} : memref<16x32xbf16, #tpu.memory_space<vmem>>, vector<16x8xbf16>,
    %33 = vector.extract_strided_slice %10 {offsets = [0, 8], sizes = [16, 8], strides = [1, 1]} : vector<16x96xbf16> to vector<16x8xbf16>
    %34 = vector.shape_cast %33 : vector<16x8xbf16> to vector<2x8x8xbf16>
    %35 = vector.extract_strided_slice %10 {offsets = [0, 40], sizes = [16, 8], strides = [1, 1]} : vector<16x96xbf16> to vector<16x8xbf16>
    %36 = vector.shape_cast %35 : vector<16x8xbf16> to vector<2x8x8xbf16>
    %37 = vector.extract_strided_slice %10 {offsets = [0, 72], sizes = [16, 8], strides = [1, 1]} : vector<16x96xbf16> to vector<16x8xbf16>
    %38 = vector.shape_cast %37 : vector<16x8xbf16> to vector<2x8x8xbf16>
    "tpu.trace_start"() <{level = 10 : i32, message = "bqd,bkd->bqk"}> : () -> ()
    %cst_14 = arith.constant dense<0.000000e+00> : vector<2x8x8xf32>
    %39 = tpu.matmul %34, %36, %cst_14 {dimension_numbers = #tpu.dot_dimension_numbers<[2], [2], [1], [1], [0, 0, 0, 1, 1, 1], [0], [0]>} : vector<2x8x8xbf16>, vector<2x8x8xbf16>, vector<2x8x8xf32> -> vector<2x8x8xf32>
    "tpu.trace_stop"() : () -> ()
    %cst_15 = arith.constant dense<0xFF800000> : vector<2x8xf32>
    %40 = vector.multi_reduction <maximumf>, %39, %cst_15 [2] : vector<2x8x8xf32> to vector<2x8xf32>
    %41 = vector.shape_cast %40 : vector<2x8xf32> to vector<2x8x1xf32>
    %42 = vector.broadcast %41 : vector<2x8x1xf32> to vector<2x8x8xf32>
    %43 = arith.subf %39, %42 : vector<2x8x8xf32>
    %44 = math.exp %43 : vector<2x8x8xf32>
    %cst_16 = arith.constant dense<0.000000e+00> : vector<2x8xf32>
    %45 = vector.multi_reduction <add>, %44, %cst_16 [2] : vector<2x8x8xf32> to vector<2x8xf32>
    %46 = vector.shape_cast %45 : vector<2x8xf32> to vector<2x8x1xf32>
    %47 = tpu.reciprocal %46 {approx = true} : vector<2x8x1xf32> -> vector<2x8x1xf32>
    %48 = arith.truncf %44 : vector<2x8x8xf32> to vector<2x8x8xbf16>
    "tpu.trace_start"() <{level = 10 : i32, message = "bqk,bkd->bqd"}> : () -> ()
    %cst_17 = arith.constant dense<0.000000e+00> : vector<2x8x8xf32>
    %49 = tpu.matmul %48, %38, %cst_17 {dimension_numbers = #tpu.dot_dimension_numbers<[2], [1], [1], [2], [0, 0, 0, 1, 1, 2], [0], [0]>} : vector<2x8x8xbf16>, vector<2x8x8xbf16>, vector<2x8x8xf32> -> vector<2x8x8xf32>
    "tpu.trace_stop"() : () -> ()
    %50 = vector.broadcast %47 : vector<2x8x1xf32> to vector<2x8x8xf32>
    %51 = arith.mulf %49, %50 : vector<2x8x8xf32>
    %52 = vector.shape_cast %51 : vector<2x8x8xf32> to vector<16x8xf32>
    %53 = arith.truncf %52 : vector<16x8xf32> to vector<16x8xbf16>
    %c0_18 = arith.constant 0 : index
    %c8 = arith.constant 8 : index
    %54 = vector.load %arg7[%c0_18, %c8] : memref<16x32xbf16, #tpu.memory_space<vmem>>, vector<16x8xbf16>
    tpu.vector_store %arg7[%c0_18, %c8], %53 {strides = array<i32>} : memref<16x32xbf16, #tpu.memory_space<vmem>>, vector<16x8xbf16>,
    %55 = vector.extract_strided_slice %10 {offsets = [0, 16], sizes = [16, 8], strides = [1, 1]} : vector<16x96xbf16> to vector<16x8xbf16>
    %56 = vector.shape_cast %55 : vector<16x8xbf16> to vector<2x8x8xbf16>
    %57 = vector.extract_strided_slice %10 {offsets = [0, 48], sizes = [16, 8], strides = [1, 1]} : vector<16x96xbf16> to vector<16x8xbf16>
    %58 = vector.shape_cast %57 : vector<16x8xbf16> to vector<2x8x8xbf16>
    %59 = vector.extract_strided_slice %10 {offsets = [0, 80], sizes = [16, 8], strides = [1, 1]} : vector<16x96xbf16> to vector<16x8xbf16>
    %60 = vector.shape_cast %59 : vector<16x8xbf16> to vector<2x8x8xbf16>
    "tpu.trace_start"() <{level = 10 : i32, message = "bqd,bkd->bqk"}> : () -> ()
    %cst_19 = arith.constant dense<0.000000e+00> : vector<2x8x8xf32>
    %61 = tpu.matmul %56, %58, %cst_19 {dimension_numbers = #tpu.dot_dimension_numbers<[2], [2], [1], [1], [0, 0, 0, 1, 1, 1], [0], [0]>} : vector<2x8x8xbf16>, vector<2x8x8xbf16>, vector<2x8x8xf32> -> vector<2x8x8xf32>
    "tpu.trace_stop"() : () -> ()
    %cst_20 = arith.constant dense<0xFF800000> : vector<2x8xf32>
    %62 = vector.multi_reduction <maximumf>, %61, %cst_20 [2] : vector<2x8x8xf32> to vector<2x8xf32>
    %63 = vector.shape_cast %62 : vector<2x8xf32> to vector<2x8x1xf32>
    %64 = vector.broadcast %63 : vector<2x8x1xf32> to vector<2x8x8xf32>
    %65 = arith.subf %61, %64 : vector<2x8x8xf32>
    %66 = math.exp %65 : vector<2x8x8xf32>
    %cst_21 = arith.constant dense<0.000000e+00> : vector<2x8xf32>
    %67 = vector.multi_reduction <add>, %66, %cst_21 [2] : vector<2x8x8xf32> to vector<2x8xf32>
    %68 = vector.shape_cast %67 : vector<2x8xf32> to vector<2x8x1xf32>
    %69 = tpu.reciprocal %68 {approx = true} : vector<2x8x1xf32> -> vector<2x8x1xf32>
    %70 = arith.truncf %66 : vector<2x8x8xf32> to vector<2x8x8xbf16>
    "tpu.trace_start"() <{level = 10 : i32, message = "bqk,bkd->bqd"}> : () -> ()
    %cst_22 = arith.constant dense<0.000000e+00> : vector<2x8x8xf32>
    %71 = tpu.matmul %70, %60, %cst_22 {dimension_numbers = #tpu.dot_dimension_numbers<[2], [1], [1], [2], [0, 0, 0, 1, 1, 2], [0], [0]>} : vector<2x8x8xbf16>, vector<2x8x8xbf16>, vector<2x8x8xf32> -> vector<2x8x8xf32>
    "tpu.trace_stop"() : () -> ()
    %72 = vector.broadcast %69 : vector<2x8x1xf32> to vector<2x8x8xf32>
    %73 = arith.mulf %71, %72 : vector<2x8x8xf32>
    %74 = vector.shape_cast %73 : vector<2x8x8xf32> to vector<16x8xf32>
    %75 = arith.truncf %74 : vector<16x8xf32> to vector<16x8xbf16>
    %c0_23 = arith.constant 0 : index
    %c16 = arith.constant 16 : index
    %76 = vector.load %arg7[%c0_23, %c16] : memref<16x32xbf16, #tpu.memory_space<vmem>>, vector<16x8xbf16>
    tpu.vector_store %arg7[%c0_23, %c16], %75 {strides = array<i32>} : memref<16x32xbf16, #tpu.memory_space<vmem>>, vector<16x8xbf16>,
    %77 = vector.extract_strided_slice %10 {offsets = [0, 24], sizes = [16, 8], strides = [1, 1]} : vector<16x96xbf16> to vector<16x8xbf16>
    %78 = vector.shape_cast %77 : vector<16x8xbf16> to vector<2x8x8xbf16>
    %79 = vector.extract_strided_slice %10 {offsets = [0, 56], sizes = [16, 8], strides = [1, 1]} : vector<16x96xbf16> to vector<16x8xbf16>
    %80 = vector.shape_cast %79 : vector<16x8xbf16> to vector<2x8x8xbf16>
    %81 = vector.extract_strided_slice %10 {offsets = [0, 88], sizes = [16, 8], strides = [1, 1]} : vector<16x96xbf16> to vector<16x8xbf16>
    %82 = vector.shape_cast %81 : vector<16x8xbf16> to vector<2x8x8xbf16>
    "tpu.trace_start"() <{level = 10 : i32, message = "bqd,bkd->bqk"}> : () -> ()
    %cst_24 = arith.constant dense<0.000000e+00> : vector<2x8x8xf32>
    %83 = tpu.matmul %78, %80, %cst_24 {dimension_numbers = #tpu.dot_dimension_numbers<[2], [2], [1], [1], [0, 0, 0, 1, 1, 1], [0], [0]>} : vector<2x8x8xbf16>, vector<2x8x8xbf16>, vector<2x8x8xf32> -> vector<2x8x8xf32>
    "tpu.trace_stop"() : () -> ()
    %cst_25 = arith.constant dense<0xFF800000> : vector<2x8xf32>
    %84 = vector.multi_reduction <maximumf>, %83, %cst_25 [2] : vector<2x8x8xf32> to vector<2x8xf32>
    %85 = vector.shape_cast %84 : vector<2x8xf32> to vector<2x8x1xf32>
    %86 = vector.broadcast %85 : vector<2x8x1xf32> to vector<2x8x8xf32>
    %87 = arith.subf %83, %86 : vector<2x8x8xf32>
    %88 = math.exp %87 : vector<2x8x8xf32>
    %cst_26 = arith.constant dense<0.000000e+00> : vector<2x8xf32>
    %89 = vector.multi_reduction <add>, %88, %cst_26 [2] : vector<2x8x8xf32> to vector<2x8xf32>
    %90 = vector.shape_cast %89 : vector<2x8xf32> to vector<2x8x1xf32>
    %91 = tpu.reciprocal %90 {approx = true} : vector<2x8x1xf32> -> vector<2x8x1xf32>
    %92 = arith.truncf %88 : vector<2x8x8xf32> to vector<2x8x8xbf16>
    "tpu.trace_start"() <{level = 10 : i32, message = "bqk,bkd->bqd"}> : () -> ()
    %cst_27 = arith.constant dense<0.000000e+00> : vector<2x8x8xf32>
    %93 = tpu.matmul %92, %82, %cst_27 {dimension_numbers = #tpu.dot_dimension_numbers<[2], [1], [1], [2], [0, 0, 0, 1, 1, 2], [0], [0]>} : vector<2x8x8xbf16>, vector<2x8x8xbf16>, vector<2x8x8xf32> -> vector<2x8x8xf32>
    "tpu.trace_stop"() : () -> ()
    %94 = vector.broadcast %91 : vector<2x8x1xf32> to vector<2x8x8xf32>
    %95 = arith.mulf %93, %94 : vector<2x8x8xf32>
    %96 = vector.shape_cast %95 : vector<2x8x8xf32> to vector<16x8xf32>
    %97 = arith.truncf %96 : vector<16x8xf32> to vector<16x8xbf16>
    %c0_28 = arith.constant 0 : index
    %c24 = arith.constant 24 : index
    %98 = vector.load %arg7[%c0_28, %c24] : memref<16x32xbf16, #tpu.memory_space<vmem>>, vector<16x8xbf16>
    tpu.vector_store %arg7[%c0_28, %c24], %97 {strides = array<i32>} : memref<16x32xbf16, #tpu.memory_space<vmem>>, vector<16x8xbf16>,
    %c0_29 = arith.constant 0 : index
    %c0_30 = arith.constant 0 : index
    %99 = vector.load %arg7[%c0_29, %c0_30] : memref<16x32xbf16, #tpu.memory_space<vmem>>, vector<16x32xbf16>
    %c0_31 = arith.constant 0 : index
    %c0_32 = arith.constant 0 : index
    %c0_33 = arith.constant 0 : index
    %100 = vector.load %arg3[%c0_31, %c0_32, %c0_33] : memref<2x32x32xbf16, #tpu.memory_space<vmem>>, vector<1x32x32xbf16>
    %101 = vector.shape_cast %100 : vector<1x32x32xbf16> to vector<32x32xbf16>
    %cst_34 = arith.constant dense<0.000000e+00> : vector<16x32xf32>
    %102 = tpu.matmul %99, %101, %cst_34 {dimension_numbers = #tpu.dot_dimension_numbers<[1], [0], [0], [1], [0, 0, 1, 1], [], []>} : vector<16x32xbf16>, vector<32x32xbf16>, vector<16x32xf32> -> vector<16x32xf32>
    %c0_35 = arith.constant 0 : index
    %c0_36 = arith.constant 0 : index
    %c0_37 = arith.constant 0 : index
    %103 = vector.load %arg5[%c0_35, %c0_36, %c0_37] : memref<2x1x32xf32, #tpu.memory_space<vmem>>, vector<1x1x32xf32>
    %104 = vector.shape_cast %103 : vector<1x1x32xf32> to vector<1x32xf32>
    %105 = vector.broadcast %104 : vector<1x32xf32> to vector<16x32xf32>
    %106 = arith.addf %102, %105 : vector<16x32xf32>
    %cst_38 = arith.constant 5.000000e-01 : f32
    %107 = vector.broadcast %cst_38 : f32 to vector<16x32xf32>
    %108 = arith.mulf %106, %107 : vector<16x32xf32>
    %109 = vector.shape_cast %108 : vector<16x32xf32> to vector<2x8x32xf32>
    %110 = arith.truncf %109 : vector<2x8x32xf32> to vector<2x8x32xbf16>
    %c0_39 = arith.constant 0 : index
    %c0_40 = arith.constant 0 : index
    %c0_41 = arith.constant 0 : index
    %111 = vector.load %arg6[%c0_39, %c0_40, %c0_41] : memref<2x8x64xbf16, #tpu.memory_space<vmem>>, vector<2x8x32xbf16>
    tpu.vector_store %arg6[%c0_39, %c0_40, %c0_41], %110 {strides = array<i32>} : memref<2x8x64xbf16, #tpu.memory_space<vmem>>, vector<2x8x32xbf16>,
    %c0_42 = arith.constant 0 : index
    %c0_43 = arith.constant 0 : index
    %c32 = arith.constant 32 : index
    %112 = vector.load %arg1[%c0_42, %c0_43, %c32] : memref<2x8x64xf32, #tpu.memory_space<vmem>>, vector<2x8x32xf32>
    %113 = arith.truncf %112 : vector<2x8x32xf32> to vector<2x8x32xbf16>
    %114 = vector.shape_cast %113 : vector<2x8x32xbf16> to vector<16x32xbf16>
    %c1 = arith.constant 1 : index
    %c0_44 = arith.constant 0 : index
    %c0_45 = arith.constant 0 : index
    %115 = vector.load %arg2[%c1, %c0_44, %c0_45] : memref<2x32x96xbf16, #tpu.memory_space<vmem>>, vector<1x32x96xbf16>
    %116 = vector.shape_cast %115 : vector<1x32x96xbf16> to vector<32x96xbf16>
    %cst_46 = arith.constant dense<0.000000e+00> : vector<16x96xf32>
    %117 = tpu.matmul %114, %116, %cst_46 {dimension_numbers = #tpu.dot_dimension_numbers<[1], [0], [0], [1], [0, 0, 1, 1], [], []>} : vector<16x32xbf16>, vector<32x96xbf16>, vector<16x96xf32> -> vector<16x96xf32>
    %c1_47 = arith.constant 1 : index
    %c0_48 = arith.constant 0 : index
    %c0_49 = arith.constant 0 : index
    %118 = vector.load %arg4[%c1_47, %c0_48, %c0_49] : memref<2x1x96xf32, #tpu.memory_space<vmem>>, vector<1x1x96xf32>
    %119 = vector.shape_cast %118 : vector<1x1x96xf32> to vector<1x96xf32>
    %120 = vector.broadcast %119 : vector<1x96xf32> to vector<16x96xf32>
    %121 = arith.addf %117, %120 : vector<16x96xf32>
    %122 = arith.truncf %121 : vector<16x96xf32> to vector<16x96xbf16>
    %123 = vector.extract_strided_slice %122 {offsets = [0, 0], sizes = [16, 8], strides = [1, 1]} : vector<16x96xbf16> to vector<16x8xbf16>
    %124 = vector.shape_cast %123 : vector<16x8xbf16> to vector<2x8x8xbf16>
    %125 = vector.extract_strided_slice %122 {offsets = [0, 32], sizes = [16, 8], strides = [1, 1]} : vector<16x96xbf16> to vector<16x8xbf16>
    %126 = vector.shape_cast %125 : vector<16x8xbf16> to vector<2x8x8xbf16>
    %127 = vector.extract_strided_slice %122 {offsets = [0, 64], sizes = [16, 8], strides = [1, 1]} : vector<16x96xbf16> to vector<16x8xbf16>
    %128 = vector.shape_cast %127 : vector<16x8xbf16> to vector<2x8x8xbf16>
    "tpu.trace_start"() <{level = 10 : i32, message = "bqd,bkd->bqk"}> : () -> ()
    %cst_50 = arith.constant dense<0.000000e+00> : vector<2x8x8xf32>
    %129 = tpu.matmul %124, %126, %cst_50 {dimension_numbers = #tpu.dot_dimension_numbers<[2], [2], [1], [1], [0, 0, 0, 1, 1, 1], [0], [0]>} : vector<2x8x8xbf16>, vector<2x8x8xbf16>, vector<2x8x8xf32> -> vector<2x8x8xf32>
    "tpu.trace_stop"() : () -> ()
    %cst_51 = arith.constant dense<0xFF800000> : vector<2x8xf32>
    %130 = vector.multi_reduction <maximumf>, %129, %cst_51 [2] : vector<2x8x8xf32> to vector<2x8xf32>
    %131 = vector.shape_cast %130 : vector<2x8xf32> to vector<2x8x1xf32>
    %132 = vector.broadcast %131 : vector<2x8x1xf32> to vector<2x8x8xf32>
    %133 = arith.subf %129, %132 : vector<2x8x8xf32>
    %134 = math.exp %133 : vector<2x8x8xf32>
    %cst_52 = arith.constant dense<0.000000e+00> : vector<2x8xf32>
    %135 = vector.multi_reduction <add>, %134, %cst_52 [2] : vector<2x8x8xf32> to vector<2x8xf32>
    %136 = vector.shape_cast %135 : vector<2x8xf32> to vector<2x8x1xf32>
    %137 = tpu.reciprocal %136 {approx = true} : vector<2x8x1xf32> -> vector<2x8x1xf32>
    %138 = arith.truncf %134 : vector<2x8x8xf32> to vector<2x8x8xbf16>
    "tpu.trace_start"() <{level = 10 : i32, message = "bqk,bkd->bqd"}> : () -> ()
    %cst_53 = arith.constant dense<0.000000e+00> : vector<2x8x8xf32>
    %139 = tpu.matmul %138, %128, %cst_53 {dimension_numbers = #tpu.dot_dimension_numbers<[2], [1], [1], [2], [0, 0, 0, 1, 1, 2], [0], [0]>} : vector<2x8x8xbf16>, vector<2x8x8xbf16>, vector<2x8x8xf32> -> vector<2x8x8xf32>
    "tpu.trace_stop"() : () -> ()
    %140 = vector.broadcast %137 : vector<2x8x1xf32> to vector<2x8x8xf32>
    %141 = arith.mulf %139, %140 : vector<2x8x8xf32>
    %142 = vector.shape_cast %141 : vector<2x8x8xf32> to vector<16x8xf32>
    %143 = arith.truncf %142 : vector<16x8xf32> to vector<16x8xbf16>
    %c0_54 = arith.constant 0 : index
    %c0_55 = arith.constant 0 : index
    %144 = vector.load %arg7[%c0_54, %c0_55] : memref<16x32xbf16, #tpu.memory_space<vmem>>, vector<16x8xbf16>
    tpu.vector_store %arg7[%c0_54, %c0_55], %143 {strides = array<i32>} : memref<16x32xbf16, #tpu.memory_space<vmem>>, vector<16x8xbf16>,
    %145 = vector.extract_strided_slice %122 {offsets = [0, 8], sizes = [16, 8], strides = [1, 1]} : vector<16x96xbf16> to vector<16x8xbf16>
    %146 = vector.shape_cast %145 : vector<16x8xbf16> to vector<2x8x8xbf16>
    %147 = vector.extract_strided_slice %122 {offsets = [0, 40], sizes = [16, 8], strides = [1, 1]} : vector<16x96xbf16> to vector<16x8xbf16>
    %148 = vector.shape_cast %147 : vector<16x8xbf16> to vector<2x8x8xbf16>
    %149 = vector.extract_strided_slice %122 {offsets = [0, 72], sizes = [16, 8], strides = [1, 1]} : vector<16x96xbf16> to vector<16x8xbf16>
    %150 = vector.shape_cast %149 : vector<16x8xbf16> to vector<2x8x8xbf16>
    "tpu.trace_start"() <{level = 10 : i32, message = "bqd,bkd->bqk"}> : () -> ()
    %cst_56 = arith.constant dense<0.000000e+00> : vector<2x8x8xf32>
    %151 = tpu.matmul %146, %148, %cst_56 {dimension_numbers = #tpu.dot_dimension_numbers<[2], [2], [1], [1], [0, 0, 0, 1, 1, 1], [0], [0]>} : vector<2x8x8xbf16>, vector<2x8x8xbf16>, vector<2x8x8xf32> -> vector<2x8x8xf32>
    "tpu.trace_stop"() : () -> ()
    %cst_57 = arith.constant dense<0xFF800000> : vector<2x8xf32>
    %152 = vector.multi_reduction <maximumf>, %151, %cst_57 [2] : vector<2x8x8xf32> to vector<2x8xf32>
    %153 = vector.shape_cast %152 : vector<2x8xf32> to vector<2x8x1xf32>
    %154 = vector.broadcast %153 : vector<2x8x1xf32> to vector<2x8x8xf32>
    %155 = arith.subf %151, %154 : vector<2x8x8xf32>
    %156 = math.exp %155 : vector<2x8x8xf32>
    %cst_58 = arith.constant dense<0.000000e+00> : vector<2x8xf32>
    %157 = vector.multi_reduction <add>, %156, %cst_58 [2] : vector<2x8x8xf32> to vector<2x8xf32>
    %158 = vector.shape_cast %157 : vector<2x8xf32> to vector<2x8x1xf32>
    %159 = tpu.reciprocal %158 {approx = true} : vector<2x8x1xf32> -> vector<2x8x1xf32>
    %160 = arith.truncf %156 : vector<2x8x8xf32> to vector<2x8x8xbf16>
    "tpu.trace_start"() <{level = 10 : i32, message = "bqk,bkd->bqd"}> : () -> ()
    %cst_59 = arith.constant dense<0.000000e+00> : vector<2x8x8xf32>
    %161 = tpu.matmul %160, %150, %cst_59 {dimension_numbers = #tpu.dot_dimension_numbers<[2], [1], [1], [2], [0, 0, 0, 1, 1, 2], [0], [0]>} : vector<2x8x8xbf16>, vector<2x8x8xbf16>, vector<2x8x8xf32> -> vector<2x8x8xf32>
    "tpu.trace_stop"() : () -> ()
    %162 = vector.broadcast %159 : vector<2x8x1xf32> to vector<2x8x8xf32>
    %163 = arith.mulf %161, %162 : vector<2x8x8xf32>
    %164 = vector.shape_cast %163 : vector<2x8x8xf32> to vector<16x8xf32>
    %165 = arith.truncf %164 : vector<16x8xf32> to vector<16x8xbf16>
    %c0_60 = arith.constant 0 : index
    %c8_61 = arith.constant 8 : index
    %166 = vector.load %arg7[%c0_60, %c8_61] : memref<16x32xbf16, #tpu.memory_space<vmem>>, vector<16x8xbf16>
    tpu.vector_store %arg7[%c0_60, %c8_61], %165 {strides = array<i32>} : memref<16x32xbf16, #tpu.memory_space<vmem>>, vector<16x8xbf16>,
    %167 = vector.extract_strided_slice %122 {offsets = [0, 16], sizes = [16, 8], strides = [1, 1]} : vector<16x96xbf16> to vector<16x8xbf16>
    %168 = vector.shape_cast %167 : vector<16x8xbf16> to vector<2x8x8xbf16>
    %169 = vector.extract_strided_slice %122 {offsets = [0, 48], sizes = [16, 8], strides = [1, 1]} : vector<16x96xbf16> to vector<16x8xbf16>
    %170 = vector.shape_cast %169 : vector<16x8xbf16> to vector<2x8x8xbf16>
    %171 = vector.extract_strided_slice %122 {offsets = [0, 80], sizes = [16, 8], strides = [1, 1]} : vector<16x96xbf16> to vector<16x8xbf16>
    %172 = vector.shape_cast %171 : vector<16x8xbf16> to vector<2x8x8xbf16>
    "tpu.trace_start"() <{level = 10 : i32, message = "bqd,bkd->bqk"}> : () -> ()
    %cst_62 = arith.constant dense<0.000000e+00> : vector<2x8x8xf32>
    %173 = tpu.matmul %168, %170, %cst_62 {dimension_numbers = #tpu.dot_dimension_numbers<[2], [2], [1], [1], [0, 0, 0, 1, 1, 1], [0], [0]>} : vector<2x8x8xbf16>, vector<2x8x8xbf16>, vector<2x8x8xf32> -> vector<2x8x8xf32>
    "tpu.trace_stop"() : () -> ()
    %cst_63 = arith.constant dense<0xFF800000> : vector<2x8xf32>
    %174 = vector.multi_reduction <maximumf>, %173, %cst_63 [2] : vector<2x8x8xf32> to vector<2x8xf32>
    %175 = vector.shape_cast %174 : vector<2x8xf32> to vector<2x8x1xf32>
    %176 = vector.broadcast %175 : vector<2x8x1xf32> to vector<2x8x8xf32>
    %177 = arith.subf %173, %176 : vector<2x8x8xf32>
    %178 = math.exp %177 : vector<2x8x8xf32>
    %cst_64 = arith.constant dense<0.000000e+00> : vector<2x8xf32>
    %179 = vector.multi_reduction <add>, %178, %cst_64 [2] : vector<2x8x8xf32> to vector<2x8xf32>
    %180 = vector.shape_cast %179 : vector<2x8xf32> to vector<2x8x1xf32>
    %181 = tpu.reciprocal %180 {approx = true} : vector<2x8x1xf32> -> vector<2x8x1xf32>
    %182 = arith.truncf %178 : vector<2x8x8xf32> to vector<2x8x8xbf16>
    "tpu.trace_start"() <{level = 10 : i32, message = "bqk,bkd->bqd"}> : () -> ()
    %cst_65 = arith.constant dense<0.000000e+00> : vector<2x8x8xf32>
    %183 = tpu.matmul %182, %172, %cst_65 {dimension_numbers = #tpu.dot_dimension_numbers<[2], [1], [1], [2], [0, 0, 0, 1, 1, 2], [0], [0]>} : vector<2x8x8xbf16>, vector<2x8x8xbf16>, vector<2x8x8xf32> -> vector<2x8x8xf32>
    "tpu.trace_stop"() : () -> ()
    %184 = vector.broadcast %181 : vector<2x8x1xf32> to vector<2x8x8xf32>
    %185 = arith.mulf %183, %184 : vector<2x8x8xf32>
    %186 = vector.shape_cast %185 : vector<2x8x8xf32> to vector<16x8xf32>
    %187 = arith.truncf %186 : vector<16x8xf32> to vector<16x8xbf16>
    %c0_66 = arith.constant 0 : index
    %c16_67 = arith.constant 16 : index
    %188 = vector.load %arg7[%c0_66, %c16_67] : memref<16x32xbf16, #tpu.memory_space<vmem>>, vector<16x8xbf16>
    tpu.vector_store %arg7[%c0_66, %c16_67], %187 {strides = array<i32>} : memref<16x32xbf16, #tpu.memory_space<vmem>>, vector<16x8xbf16>,
    %189 = vector.extract_strided_slice %122 {offsets = [0, 24], sizes = [16, 8], strides = [1, 1]} : vector<16x96xbf16> to vector<16x8xbf16>
    %190 = vector.shape_cast %189 : vector<16x8xbf16> to vector<2x8x8xbf16>
    %191 = vector.extract_strided_slice %122 {offsets = [0, 56], sizes = [16, 8], strides = [1, 1]} : vector<16x96xbf16> to vector<16x8xbf16>
    %192 = vector.shape_cast %191 : vector<16x8xbf16> to vector<2x8x8xbf16>
    %193 = vector.extract_strided_slice %122 {offsets = [0, 88], sizes = [16, 8], strides = [1, 1]} : vector<16x96xbf16> to vector<16x8xbf16>
    %194 = vector.shape_cast %193 : vector<16x8xbf16> to vector<2x8x8xbf16>
    "tpu.trace_start"() <{level = 10 : i32, message = "bqd,bkd->bqk"}> : () -> ()
    %cst_68 = arith.constant dense<0.000000e+00> : vector<2x8x8xf32>
    %195 = tpu.matmul %190, %192, %cst_68 {dimension_numbers = #tpu.dot_dimension_numbers<[2], [2], [1], [1], [0, 0, 0, 1, 1, 1], [0], [0]>} : vector<2x8x8xbf16>, vector<2x8x8xbf16>, vector<2x8x8xf32> -> vector<2x8x8xf32>
    "tpu.trace_stop"() : () -> ()
    %cst_69 = arith.constant dense<0xFF800000> : vector<2x8xf32>
    %196 = vector.multi_reduction <maximumf>, %195, %cst_69 [2] : vector<2x8x8xf32> to vector<2x8xf32>
    %197 = vector.shape_cast %196 : vector<2x8xf32> to vector<2x8x1xf32>
    %198 = vector.broadcast %197 : vector<2x8x1xf32> to vector<2x8x8xf32>
    %199 = arith.subf %195, %198 : vector<2x8x8xf32>
    %200 = math.exp %199 : vector<2x8x8xf32>
    %cst_70 = arith.constant dense<0.000000e+00> : vector<2x8xf32>
    %201 = vector.multi_reduction <add>, %200, %cst_70 [2] : vector<2x8x8xf32> to vector<2x8xf32>
    %202 = vector.shape_cast %201 : vector<2x8xf32> to vector<2x8x1xf32>
    %203 = tpu.reciprocal %202 {approx = true} : vector<2x8x1xf32> -> vector<2x8x1xf32>
    %204 = arith.truncf %200 : vector<2x8x8xf32> to vector<2x8x8xbf16>
    "tpu.trace_start"() <{level = 10 : i32, message = "bqk,bkd->bqd"}> : () -> ()
    %cst_71 = arith.constant dense<0.000000e+00> : vector<2x8x8xf32>
    %205 = tpu.matmul %204, %194, %cst_71 {dimension_numbers = #tpu.dot_dimension_numbers<[2], [1], [1], [2], [0, 0, 0, 1, 1, 2], [0], [0]>} : vector<2x8x8xbf16>, vector<2x8x8xbf16>, vector<2x8x8xf32> -> vector<2x8x8xf32>
    "tpu.trace_stop"() : () -> ()
    %206 = vector.broadcast %203 : vector<2x8x1xf32> to vector<2x8x8xf32>
    %207 = arith.mulf %205, %206 : vector<2x8x8xf32>
    %208 = vector.shape_cast %207 : vector<2x8x8xf32> to vector<16x8xf32>
    %209 = arith.truncf %208 : vector<16x8xf32> to vector<16x8xbf16>
    %c0_72 = arith.constant 0 : index
    %c24_73 = arith.constant 24 : index
    %210 = vector.load %arg7[%c0_72, %c24_73] : memref<16x32xbf16, #tpu.memory_space<vmem>>, vector<16x8xbf16>
    tpu.vector_store %arg7[%c0_72, %c24_73], %209 {strides = array<i32>} : memref<16x32xbf16, #tpu.memory_space<vmem>>, vector<16x8xbf16>,
    %c0_74 = arith.constant 0 : index
    %c0_75 = arith.constant 0 : index
    %211 = vector.load %arg7[%c0_74, %c0_75] : memref<16x32xbf16, #tpu.memory_space<vmem>>, vector<16x32xbf16>
    %c1_76 = arith.constant 1 : index
    %c0_77 = arith.constant 0 : index
    %c0_78 = arith.constant 0 : index
    %212 = vector.load %arg3[%c1_76, %c0_77, %c0_78] : memref<2x32x32xbf16, #tpu.memory_space<vmem>>, vector<1x32x32xbf16>
    %213 = vector.shape_cast %212 : vector<1x32x32xbf16> to vector<32x32xbf16>
    %cst_79 = arith.constant dense<0.000000e+00> : vector<16x32xf32>
    %214 = tpu.matmul %211, %213, %cst_79 {dimension_numbers = #tpu.dot_dimension_numbers<[1], [0], [0], [1], [0, 0, 1, 1], [], []>} : vector<16x32xbf16>, vector<32x32xbf16>, vector<16x32xf32> -> vector<16x32xf32>
    %c1_80 = arith.constant 1 : index
    %c0_81 = arith.constant 0 : index
    %c0_82 = arith.constant 0 : index
    %215 = vector.load %arg5[%c1_80, %c0_81, %c0_82] : memref<2x1x32xf32, #tpu.memory_space<vmem>>, vector<1x1x32xf32>
    %216 = vector.shape_cast %215 : vector<1x1x32xf32> to vector<1x32xf32>
    %217 = vector.broadcast %216 : vector<1x32xf32> to vector<16x32xf32>
    %218 = arith.addf %214, %217 : vector<16x32xf32>
    %cst_83 = arith.constant 5.000000e-01 : f32
    %219 = vector.broadcast %cst_83 : f32 to vector<16x32xf32>
    %220 = arith.mulf %218, %219 : vector<16x32xf32>
    %221 = vector.shape_cast %220 : vector<16x32xf32> to vector<2x8x32xf32>
    %222 = arith.truncf %221 : vector<2x8x32xf32> to vector<2x8x32xbf16>
    %c0_84 = arith.constant 0 : index
    %c0_85 = arith.constant 0 : index
    %c32_86 = arith.constant 32 : index
    %223 = vector.load %arg6[%c0_84, %c0_85, %c32_86] : memref<2x8x64xbf16, #tpu.memory_space<vmem>>, vector<2x8x32xbf16>
    tpu.vector_store %arg6[%c0_84, %c0_85, %c32_86], %222 {strides = array<i32>} : memref<2x8x64xbf16, #tpu.memory_space<vmem>>, vector<2x8x32xbf16>,
    return
  }
  func.func @transform_0(%arg0: i32) -> (i32, i32, i32) {
    %c0_i32 = arith.constant 0 : i32
    %c0_i32_0 = arith.constant 0 : i32
    %c0_i32_1 = arith.constant 0 : i32
    return %c0_i32, %arg0, %c0_i32_0 : i32, i32, i32
  }
  func.func @transform_1(%arg0: i32) -> (i32, i32, i32) {
    %c0_i32 = arith.constant 0 : i32
    %c0_i32_0 = arith.constant 0 : i32
    %c0_i32_1 = arith.constant 0 : i32
    %c0_i32_2 = arith.constant 0 : i32
    return %c0_i32, %c0_i32_0, %c0_i32_1 : i32, i32, i32
  }
  func.func @transform_2(%arg0: i32) -> (i32, i32, i32) {
    %c0_i32 = arith.constant 0 : i32
    %c0_i32_0 = arith.constant 0 : i32
    %c0_i32_1 = arith.constant 0 : i32
    %c0_i32_2 = arith.constant 0 : i32
    return %c0_i32, %c0_i32_0, %c0_i32_1 : i32, i32, i32
  }
  func.func @transform_3(%arg0: i32) -> (i32, i32, i32) {
    %c0_i32 = arith.constant 0 : i32
    %c0_i32_0 = arith.constant 0 : i32
    %c0_i32_1 = arith.constant 0 : i32
    %c0_i32_2 = arith.constant 0 : i32
    return %c0_i32, %c0_i32_0, %c0_i32_1 : i32, i32, i32
  }
  func.func @transform_4(%arg0: i32) -> (i32, i32, i32) {
    %c0_i32 = arith.constant 0 : i32
    %c0_i32_0 = arith.constant 0 : i32
    %c0_i32_1 = arith.constant 0 : i32
    %c0_i32_2 = arith.constant 0 : i32
    return %c0_i32, %c0_i32_0, %c0_i32_1 : i32, i32, i32
  }
  func.func @transform_5(%arg0: i32) -> (i32, i32, i32) {
    %c0_i32 = arith.constant 0 : i32
    %c0_i32_0 = arith.constant 0 : i32
    %c0_i32_1 = arith.constant 0 : i32
    return %c0_i32, %arg0, %c0_i32_0 : i32, i32, i32
  }
}

</mosaic_0001>

<bundles_post_ra>
// kernel: tpu_custom_call.1
= control target key start
LH: loop header
LB: loop body
LE: loop exit
PB: predicated region body
PF: predicated region fallthrough
CT: control target
= control target key end

     0   :  { %10 = vsyncpa [#allocation4], 0  ;;  %s4113_s0 = inlined_call_operand.hbm [shape: f32[2,16,64], index: 0, kind: input, shape index: {}]   ;;  %s4114_s1 = inlined_call_operand.hbm [shape: bf16[2,32,96], index: 1, kind: input, shape index: {}]   ;;  %s4115_s2 = inlined_call_operand.hbm [shape: bf16[2,32,32], index: 2, kind: input, shape index: {}]   ;;  %s4116_s3 = inlined_call_operand.hbm [shape: f32[2,1,96], index: 3, kind: input, shape index: {}]   ;;  %s4117_s4 = inlined_call_operand.hbm [shape: f32[2,1,32], index: 4, kind: input, shape index: {}]   ;;  %s4118_s5 = inlined_call_operand.hbm [shape: bf16[2,16,64], index: 5, kind: output, shape index: {}]  }
   0x1   :  { %12 = vsyncpa [#allocation4 + $0x1], 0 }
   0x2   :  { %13 = vsyncpa [#allocation7], 0 }
   0x3   :  { %14 = vsyncpa [#allocation10], 0 }
   0x4   :  { %15 = vsyncpa [#allocation5], 0 }
   0x5   :  { %17 = vsyncpa [#allocation5 + $0x1], 0  ;;  %s3404_s18 = smov 0   ;;  %s3406_s19 = smov 0  }
   0x6   :  { %s3408_s20 = smov 0   ;;  %s3410_s21 = smov 0  }
   0x7 LB: > { %s3425_s22 = sadd.s32 4294967295, %s3340_s21   ;;  %s2555_s23 = sadd.s32 4294967294, %s3340_s21   ;;  %s3340_s21 = sphi %s3410_s21, %s4143_s21   ;;  %s3336_s20 = sphi %s3408_s20, %s4142_s20   ;;  %s3332_s19 = sphi %s3406_s19, %s4141_s19   ;;  %s3328_s18 = sphi %s3404_s18, %s4140_s18  }
   0x8   : > { %p43_p0 = scmp.ne.s32.totalorder %s3332_s19, %s3328_s18  ;;  %p4119_p1 = scmp.eq.s32.totalorder %s3425_s22, 0 }
   0x9   : > { %p157_p3 = scmp.eq.s32.totalorder %s2555_s23, 1  ;;  %p2556_p5 = scmp.ge.s32.totalorder %s3340_s21, 1 }
   0xa   : > { %p3434_p4 = por %p4119_p1, %p43_p0  ;;  %p164_p7 = scmp.lt.s32.totalorder %s3340_s21, 3 }
   0xb   : > { %p3439_p6 = por %p157_p3, %p43_p0  ;;  %s3342_s27 = smov [#allocation6]  }
   0xc   : > { %s4123_s24 = scalar_select %p3434_p4, 1, 0 }
   0xd   : > { %s4124_s25 = scalar_select %p3439_p6, 1, 0 }
   0xe   : > { %p3444_p8 = pnand %p2556_p5, %p164_p7  ;;  %s176_s28 = sshll.u32 %s3342_s27, 4  ;;  %s3448_s28 = int_to_ptr.vmem [resolvable:$true] %s176_s28 }
   0xf   : > { %s3343_s30 = smov [#allocation9]   ;;  %s3124_s9 = scalar_lea.hbm %s4114_s1, 512 }
  0x10   : > { %s4125_s26 = scalar_select %p3444_p8, 1, 0 }
  0x11   : > { %p2959_p9 = pneg %p3444_p8  ;;  %s202_s6 = sshll.u32 %s3343_s30, 4  ;;  %s3459_s6 = int_to_ptr.vmem [resolvable:$true] %s202_s6 }
  0x12   : > { %p3125_p12 = scmp.ne.s32.totalorder %s4114_s1, %s3124_s9  ;;  %p3131_p5 = scmp.lt.u32.totalorder %s3124_s9, %s4114_s1 }
  0x13   : > { %p3455_p11 = pnand %p2959_p9, %p4119_p1 }
  0x15   : > { %p3469_p13 = pneg %p3455_p11 }
  0x17   : > { %p3127_p0 = pnand %p3469_p13, %p3125_p12 }
  0x19   : > { %p3128_p3 = pneg %p3127_p0 }
  0x1b   : > { %p3133_p7 = pnand %p3131_p5, %p3128_p3 }
  0x1d   : > { %3136 = shalt.err (!%p3133_p7)
}
  0x1e   : > { %s3137_s15 = scalar_lea.vmem %s3448_s28, 512  ;;  %p3145_p2 = scmp.lt.s32.totalorder %s3448_s28, %s3448_s28 }
  0x1f   : > { %p3138_p9 = scmp.ne.s32.totalorder %s3448_s28, %s3137_s15  ;;  %p3146_p6 = scmp.lt.s32.totalorder %s3137_s15, %s3137_s15 }
  0x21   : > { %p3140_p10 = pnand %p3138_p9, %p3469_p13  ;;  %p3147_p12 = por %p3146_p6, %p3145_p2 }
  0x23   : > { %p3141_p1 = pneg %p3140_p10 }
  0x25   : > { %p3148_p0 = pnand %p3147_p12, %p3141_p1 }
  0x27   : > { %3151 = shalt.err (!%p3148_p0)
}
  0x28   : > { %s4120_s16 = smov 64   ;;  %s3345_s17 = smov 4  }
  0x29   : > { %2962 = dma.hbm_to_vmem [thread:$0]  (!%p3455_p11), %s4114_s1, 512, %s3448_s28, [#allocation7], %s4120_s16, %s4120_s16, %s3345_s17  }
  0x2a   : > { %s3152_s8 = scalar_lea.hbm %s4116_s3, 32 }
  0x2b   : > { %p3153_p1 = scmp.ne.s32.totalorder %s4116_s3, %s3152_s8  ;;  %p3159_p10 = scmp.lt.u32.totalorder %s3152_s8, %s4116_s3 }
  0x2d   : > { %p3155_p2 = pnand %p3153_p1, %p3469_p13 }
  0x2f   : > { %p3156_p6 = pneg %p3155_p2 }
  0x31   : > { %p3161_p3 = pnand %p3159_p10, %p3156_p6 }
  0x33   : > { %3164 = shalt.err (!%p3161_p3)
}
  0x34   : > { %s3165_s28 = scalar_lea.vmem %s3459_s6, 32  ;;  %p3173_p12 = scmp.lt.s32.totalorder %s3459_s6, %s3459_s6 }
  0x35   : > { %p3166_p5 = scmp.ne.s32.totalorder %s3459_s6, %s3165_s28  ;;  %p3174_p0 = scmp.lt.s32.totalorder %s3165_s28, %s3165_s28 }
  0x37   : > { %p3168_p7 = pnand %p3166_p5, %p3469_p13  ;;  %p3175_p1 = por %p3174_p0, %p3173_p12 }
  0x39   : > { %p3169_p9 = pneg %p3168_p7 }
  0x3b   : > { %p3176_p2 = pnand %p3175_p1, %p3169_p9 }
  0x3d   : > { %3179 = shalt.err (!%p3176_p2)
}
  0x3e   : > { %s3346_s14 = smov 16   ;;  %s3347_s15 = smov 1  }
  0x3f   : > { %2968 = dma.hbm_to_vmem [thread:$0]  (!%p3455_p11), %s4116_s3, 32, %s3459_s6, [#allocation10], %s3346_s14, %s3346_s14, %s3347_s15  }
  0x40   : > { %s3348_s30 = smov [#allocation8]   ;;  %s3349_s8 = smov [#allocation11]  }
  0x41   : > { %s189_s7 = sshll.u32 %s3348_s30, 4  ;;  %s215_s9 = sshll.u32 %s3349_s8, 4  ;;  %s190_s7 = int_to_ptr.vmem [resolvable:$true] %s189_s7  ;;  %s3519_s9 = int_to_ptr.vmem [resolvable:$true] %s215_s9 }
  0x42   : > { %s3180_s13 = scalar_lea.hbm %s4115_s2, 512 }
  0x43   : > { %p3181_p6 = scmp.ne.s32.totalorder %s4115_s2, %s3180_s13  ;;  %p3187_p5 = scmp.lt.u32.totalorder %s3180_s13, %s4115_s2 }
  0x45   : > { %p3183_p10 = pnand %p3181_p6, %p3469_p13 }
  0x47   : > { %p3184_p3 = pneg %p3183_p10 }
  0x49   : > { %p3189_p7 = pnand %p3187_p5, %p3184_p3 }
  0x4b   : > { %3192 = shalt.err (!%p3189_p7)
}
  0x4c   : > { %s3193_s27 = scalar_lea.vmem %s190_s7, 512  ;;  %p3201_p1 = scmp.lt.s32.totalorder %s190_s7, %s190_s7 }
  0x4d   : > { %p3194_p9 = scmp.ne.s32.totalorder %s190_s7, %s3193_s27  ;;  %p3202_p2 = scmp.lt.s32.totalorder %s3193_s27, %s3193_s27 }
  0x4f   : > { %p3196_p12 = pnand %p3194_p9, %p3469_p13  ;;  %p3203_p4 = por %p3202_p2, %p3201_p1 }
  0x51   : > { %p3197_p0 = pneg %p3196_p12 }
  0x53   : > { %p3204_p8 = pnand %p3203_p4, %p3197_p0 }
  0x55   : > { %3207 = shalt.err (!%p3204_p8)
}
  0x56   : > { %s4128_s16 = smov 64   ;;  %s3208_s13 = scalar_lea.hbm %s4117_s4, 32 }
  0x57   : > { %2965 = dma.hbm_to_vmem [thread:$0]  (!%p3455_p11), %s4115_s2, 512, %s190_s7, [#allocation7], %s4128_s16, %s4128_s16, %s3345_s17  }
  0x58   : > { %p3209_p6 = scmp.ne.s32.totalorder %s4117_s4, %s3208_s13  ;;  %p3215_p10 = scmp.lt.u32.totalorder %s3208_s13, %s4117_s4 }
  0x5a   : > { %p3211_p4 = pnand %p3209_p6, %p3469_p13 }
  0x5c   : > { %p3212_p8 = pneg %p3211_p4 }
  0x5e   : > { %p3217_p3 = pnand %p3215_p10, %p3212_p8 }
  0x60   : > { %3220 = shalt.err (!%p3217_p3)
}
  0x61   : > { %s3221_s17 = scalar_lea.vmem %s3519_s9, 32  ;;  %p3229_p12 = scmp.lt.s32.totalorder %s3519_s9, %s3519_s9 }
  0x62   : > { %p3222_p5 = scmp.ne.s32.totalorder %s3519_s9, %s3221_s17  ;;  %p3230_p0 = scmp.lt.s32.totalorder %s3221_s17, %s3221_s17 }
  0x64   : > { %p3224_p7 = pnand %p3222_p5, %p3469_p13  ;;  %p3231_p1 = por %p3230_p0, %p3229_p12 }
  0x66   : > { %p3225_p9 = pneg %p3224_p7 }
  0x68   : > { %p3232_p2 = pnand %p3231_p1, %p3225_p9 }
  0x6a   : > { %3235 = shalt.err (!%p3232_p2)
}
  0x6b   : > { %2971 = dma.hbm_to_vmem [thread:$0]  (!%p3455_p11), %s4117_s4, 32, %s3519_s9, [#allocation10], %s3346_s14, %s3346_s14, %s3347_s15  }
  0x6c   : > { %s3569_s29 = sadd.s32 1, %s3340_s21   ;;  %s30_s30 = sadd.s32 1, %s3336_s20 }
  0x6d   : > { %s27_s12 = ssub.s32 %s3340_s21, %s3569_s29  ;;  %p37_p6 = scmp.ne.s32.totalorder %s3336_s20, %s3332_s19 }
  0x6e   : > { %p28_p13 = scmp.eq.s32.totalorder %s27_s12, 0  ;;  %p38_p4 = scmp.eq.s32.totalorder %s3340_s21, 0 }
  0x6f   : > { %p4129_p10 = scmp.eq.s32.totalorder %s3425_s22, 1  ;;  %p2984_p5 = scmp.lt.s32.totalorder %s3340_s21, 2 }
  0x70   : > { %s3578_s8 = scalar_select %p28_p13, %s3336_s20, %s30_s30  }
  0x71   : > { %p39_p8 = por %p38_p4, %p37_p6  ;;  %p3582_p3 = por %p4129_p10, %p37_p6 }
  0x72   : > { %s229_s11 = sand.u32 1, %s3336_s20   ;;  %s2563_s14 = sshll.u32 %s3340_s21, 7 }
  0x73   : > { %s2562_s13 = sshll.u32 %s229_s11, 4  ;;  %s3592_s28 = scalar_lea.hbm %s4113_s0, %s2563_s14 }
  0x74   : > { %s233_s23 = scalar_lea.vmem [#allocation3], %s2562_s13  ;;  %p3596_p11 = pnand %p2984_p5, %p39_p8 }
  0x75   : > { %s239_s6 = sshll.u32 %s233_s23, 4  ;;  %s3600_s17 = scalar_lea.sflag [#allocation4], %s229_s11  ;;  %s3594_s6 = int_to_ptr.vmem [resolvable:$true] %s239_s6 }
  0x76   : > { %s3236_s7 = scalar_lea.hbm %s3592_s28, 256  ;;  %p3238_p9 = pneg %p3596_p11 }
  0x77   : > { %p3237_p7 = scmp.ne.s32.totalorder %s3592_s28, %s3236_s7  ;;  %s3241_s30 = scalar_lea.hbm %s4113_s0, 512 }
  0x78   : > { %p3242_p1 = scmp.lt.u32.totalorder %s3592_s28, %s4113_s0  ;;  %p3243_p2 = scmp.lt.u32.totalorder %s3241_s30, %s3236_s7 }
  0x79   : > { %p3239_p12 = pnand %p3238_p9, %p3237_p7  ;;  %p3245_p6 = scmp.lt.u32.totalorder %s3236_s7, %s3592_s28 }
  0x7a   : > { %p3244_p13 = por %p3243_p2, %p3242_p1 }
  0x7b   : > { %p3240_p0 = pneg %p3239_p12 }
  0x7c   : > { %p3246_p4 = por %p3245_p6, %p3244_p13 }
  0x7e   : > { %p3247_p8 = pnand %p3246_p4, %p3240_p0 }
  0x80   : > { %3250 = shalt.err (!%p3247_p8)
}
  0x81   : > { %s3251_s11 = scalar_lea.vmem %s3594_s6, 256  ;;  %s3350_s15 = smov [#allocation3]  }
  0x82   : > { %p3252_p10 = scmp.ne.s32.totalorder %s3594_s6, %s3251_s11  ;;  %s3256_s9 = sshll.u32 %s3350_s15, 4  ;;  %s3257_s9 = int_to_ptr.vmem [resolvable:$false] %s3256_s9 }
  0x83   : > { %s3258_s23 = scalar_lea.vmem %s3257_s9, 512  ;;  %p3259_p12 = scmp.lt.s32.totalorder %s3594_s6, %s3257_s9 }
  0x84   : > { %p3254_p5 = pnand %p3252_p10, %p3238_p9  ;;  %p3260_p1 = scmp.lt.s32.totalorder %s3258_s23, %s3251_s11 }
  0x86   : > { %p3255_p7 = pneg %p3254_p5  ;;  %p3261_p2 = por %p3260_p1, %p3259_p12 }
  0x88   : > { %p3262_p13 = pnand %p3261_p2, %p3255_p7 }
  0x8a   : > { %3265 = shalt.err (!%p3262_p13)
}
  0x8b   : > { %s3351_s7 = smov 256   ;;  %s3352_s16 = smov 128  }
  0x8c   : > { %s3353_s12 = smov 8   ;;  %p4132_p9 = scmp.ne.s32.totalorder %s4125_s26, 0 }
  0x8d   : > { %2975 = dma.hbm_to_vmem [thread:$0]  (!%p3596_p11), %s3592_s28, 256, %s3594_s6, %s3600_s17, %s3351_s7, %s3352_s16, %s3353_s12  }
  0x8e   : > { %251 = sbr.rel (%p4132_p9) target bundleno = 4577 (0x11e1), region = 40  ;;  %s3631_s30 = sand.u32 (!%p4132_p9), 1, %s3332_s19  }
  0x8f   : > { %s2565_s13 = sshll.u32 (!%p4132_p9), %s3631_s30, 4  ;;  %s254_s14 = scalar_lea.sflag (!%p4132_p9), [#allocation4], %s3631_s30 }
  0x90   : > { %s257_s11 = scalar_lea.vmem (!%p4132_p9), [#allocation3], %s2565_s13  ;;  %p4133_p0 = scmp.ne.s32.totalorder (!%p4132_p9), %s4123_s24, 0 }
  0x95   : > { %3311 = dma.done.wait (%p4133_p0), %s254_s14, 256  }
  0x96   : > { %3313 = vsyncadd (%p4133_p0), %s254_s14, 4294967040  ;;  %p4134_p6 = scmp.eq.s32.totalorder %s3425_s22, 0 }
  0x98   : > { %3315 = dma.done.wait (%p4134_p6), [#allocation7], 1024   ;;  %p4135_p11 = pmov %p4134_p6 }
  0x99   : > { %p4136_p4 = pmov %p4134_p6 }
  0x9a   : > { %3317 = vsyncadd (%p4135_p11), [#allocation7], 4294966272 }
  0x9b   : > { %3319 = dma.done.wait (%p4136_p4), [#allocation10], 64   ;;  %p4137_p8 = pmov %p4136_p4 }
  0x9c   : > { %v3354_v0 = vmov 0.0   ;;  %vm3355_vm0 = vmmov 0   ;;  %v3052_v1 = vld [vmem:[#allocation6] sm:$0xff]   ;;  %v3053_v2 = vld [vmem:[#allocation6 + $0x8] sm:$0xff]   ;;  %vm333_vm1 = vcmask 261120   ;;  %s3356_s24 = smov 96  }
  0x9d   : > { %3321 = vsyncadd (%p4137_p8), [#allocation10], 4294967232  ;;  %2715 = vmatprep.subr.bf16.mxu0 %v3354_v0  ;;  %2719 = vmatprep.mubr.msk.bf16.mxu0 %vm3355_vm0, %v3354_v0  ;;  %v301_v3 = vld [vmem:[%s257_s11] sm:$0xff]  ;;  %v302_v4 = vld [vmem:[%s257_s11 + $0x8] sm:$0xff]  ;;  %s3357_s26 = smov 64   ;;  %s3358_s28 = smov 88  }
  0x9e   : > { %2723 = vmatprep.subr.bf16.mxu1 %v3354_v0  ;;  %2725 = vmatprep.mubr.msk.bf16.mxu1 %vm3355_vm0, %v3354_v0  ;;  %v3654_v5 = vpack.c.bf16 %v302_v4, %v301_v3  ;;  %v2571_v8 = vld [vmem:[#allocation9] ss:$0 sm:$0xff]  ;;  %s3359_s6 = smov 120   ;;  %s3360_s27 = smov 56   ;;  %vm386_vm2 = vcmask 64512   ;;  %vm508_vm3 = vcmask 1043456  }
  0x9f   : > { %2716 = vmatpush3.bf16.msra.mxu0 %v3052_v1  ;;  %s3361_s17 = smov 80   ;;  %s3362_s15 = smov 112   ;;  %vm829_vm4 = vcmask 130112   ;;  %vm1056_vm5 = vcmask 195712   ;;  %vm1283_vm6 = vcmask 261312   ;;  %vm1357_vm7 = vcmask 257024  }
  0xa0   : > { %2717 = vmatprep.subr.bf16.mxu0 %v3354_v0  ;;  %s3363_s9 = smov 48   ;;  %s3364_s23 = smov 72   ;;  %vm2428_vm8 = vcmask 519424  }
  0xa1   : > { %s3365_s7 = smov 104   ;;  %s3366_s16 = smov 40  }
  0xa2   : > { %s3367_s12 = smov 16   ;;  %s3368_s13 = smov 8  }
  0xa3   : > { %2718 = vmatpush3.bf16.msra.mxu0 %v3053_v2  ;;  %s3369_s14 = smov 24   ;;  %s2570_s11 = sshll.u32 %s3631_s30, 3 }
  0xa4   : > { %2729 = vmatprep.subr.bf16.mxu0 %v3354_v0 }
  0xa6   : > { %2720 = vmatmul.mubr.msk.bf16.vlgmr.msra.gmra.mrb[0].mxu0 %vm333_vm1, %v3654_v5 }
  0xa7   : > { %2731 = vmatprep.mubr.msk.bf16.mxu0 %vm3355_vm0, %v3354_v0 }
 0x179   : > { %v371_v6 = vpop.f32.mrb[0].mxu0 }
 0x17a   : > { %v2721_v7 = vpop.f32.mrb[1].mxu0  ;;  %v372_v12 = vadd.f32 %v2571_v8, %v371_v6 }
 0x17b   : > { %v374_v9 = vpop.f32.mrb[2].mxu0 }
 0x17c   : > { %v375_v10 = vadd.f32 %v2571_v8, %v374_v9  ;;  %v2722_v11 = vpop.f32.mrb[3].mxu0  ;;  %v3665_v14 = vpack.c.bf16 %v372_v12, %v372_v12 }
 0x17e   : > { %v3661_v13 = vpack.c.bf16 %v375_v10, %v375_v10 }
 0x180   : > { %433 = vrot.lane.b32.xlu0 %v3661_v13, %s3356_s24 }
 0x184   : > { %384 = vrot.lane.b32.xlu0 %v3665_v14, %s3356_s24 }
 0x188   : > { %552 = vrot.lane.b32.xlu0 %v3661_v13, %s3357_s26 }
 0x18c   : > { %656 = vrot.lane.b32.xlu0 %v3661_v13, %s3358_s28 }
 0x190   : > { %606 = vrot.lane.b32.xlu0 %v3665_v14, %s3358_s28 }
 0x194   : > { %654 = vrot.lane.b32.xlu0 %v3661_v13, %s3359_s6 }
 0x198   : > { %604 = vrot.lane.b32.xlu0 %v3665_v14, %s3359_s6 }
 0x19c   : > { %774 = vrot.lane.b32.xlu0 %v3661_v13, %s3360_s27 }
 0x1f2   : > { %v434_v15 = vpop.permute.xlu0 %433 }
 0x1f3   : > { %v439_v16 = vsel %vm386_vm2, %v434_v15, 0 }
 0x1f4   : > { %2730 = vmatpush3.bf16.xpose.msra.mxu0 %v439_v16 }
 0x1f5   : > { %2741 = vmatprep.subr.bf16.mxu0 %v3354_v0 }
 0x1f6   : > { %v385_v17 = vpop.permute.xlu0 %384 }
 0x1f7   : > { %v391_v18 = vsel %vm386_vm2, %v385_v17, 0 }
 0x1f8   : > { %2724 = vmatpush3.bf16.xpose.msra.mxu1 %v391_v18 }
 0x1f9   : > { %2735 = vmatprep.subr.bf16.mxu1 %v3354_v0 }
 0x1fa   : > { %v553_v19 = vpop.permute.xlu0 %552 }
 0x1fb   : > { %v558_v20 = vsel %vm508_vm3, %v553_v19, 0  ;;  %2732 = vmatmul.mubr.msk.bf16.vlgmr.msra.gmra.mrb[4].mxu0 %vm386_vm2, %v3661_v13 }
 0x1fc   : > { %2742 = vmatpush3.bf16.msra.mxu0 %v558_v20  ;;  %2743 = vmatprep.mubr.msk.bf16.mxu0 %vm3355_vm0, %v3354_v0 }
 0x1fd   : > { %2753 = vmatprep.subr.bf16.mxu0 %v3354_v0 }
 0x1fe   : > { %v657_v33 = vpop.permute.xlu0 %656 }
 0x1ff   : > { %2726 = vmatmul.mubr.msk.bf16.vlgmr.msra.gmra.mrb[0].mxu1 %vm386_vm2, %v3665_v14  ;;  %v662_v48 = vsel %vm386_vm2, %v657_v33, 0 }
 0x200   : > { %2737 = vmatprep.mubr.msk.bf16.mxu1 %vm3355_vm0, %v3354_v0 }
 0x202   : > { %v607_v39 = vpop.permute.xlu0 %606 }
 0x203   : > { %v612_v44 = vsel %vm386_vm2, %v607_v39, 0 }
 0x206   : > { %v655_v42 = vpop.permute.xlu0 %654 }
 0x20a   : > { %v605_v47 = vpop.permute.xlu0 %604 }
 0x20e   : > { %v775_v51 = vpop.permute.xlu0 %774 }
 0x20f   : > { %v780_v52 = vsel %vm508_vm3, %v775_v51, 0 }
 0x2ce   : > { %v475_v21 = vpop.f32.mrb[4].mxu0 }
 0x2cf   : > { %v2733_v22 = vpop.f32.mrb[5].mxu0  ;;  %v484_v30 = vsel %vm386_vm2, %v475_v21, -inf }
 0x2d0   : > { %v478_v23 = vpop.f32.mrb[6].mxu0 }
 0x2d1   : > { %v2734_v24 = vpop.f32.mrb[7].mxu0 }
 0x2d2   : > { %v427_v25 = vpop.f32.mrb[0].mxu1 }
 0x2d3   : > { %v2727_v26 = vpop.f32.mrb[1].mxu1  ;;  %v481_v27 = vsel %vm386_vm2, %v427_v25, -inf }
 0x2d4   : > { %482 = vmax.xlane.f32.xlu1 %v481_v27  ;;  %v430_v28 = vpop.f32.mrb[2].mxu1 }
 0x2d5   : > { %v2728_v29 = vpop.f32.mrb[3].mxu1 }
 0x2d8   : > { %485 = vmax.xlane.f32.xlu1 %v484_v30 }
 0x2e9   : > { %503 = vrot.lane.b32.xlu1 %v3665_v14, %s3357_s26 }
 0x2ed   : > { %726 = vrot.lane.b32.xlu1 %v3665_v14, %s3360_s27 }
 0x361   : > { %v483_v31 = vpop.xlane.xlu1 %482 }
 0x362   : > { %v487_v32 = vsub.f32 %v427_v25, %v483_v31 }
 0x364   : > { %v489_v34 = vmul.f32 1.442695, %v487_v32 }
 0x365   : > { %v486_v35 = vpop.xlane.xlu1 %485 }
 0x366   : > { %3060 = vpow2.f32 %v489_v34  ;;  %v488_v36 = vsub.f32 %v475_v21, %v486_v35 }
 0x368   : > { %v491_v37 = vmul.f32 1.442695, %v488_v36 }
 0x369   : > { %v504_v38 = vpop.permute.xlu1 %503 }
 0x36a   : > { %3062 = vpow2.f32 %v491_v37  ;;  %v510_v40 = vsel %vm508_vm3, %v504_v38, 0 }
 0x36b   : > { %2736 = vmatpush3.bf16.msra.mxu1 %v510_v40 }
 0x36c   : > { %2747 = vmatprep.subr.bf16.mxu1 %v3354_v0 }
 0x36d   : > { %v727_v49 = vpop.permute.xlu1 %726 }
 0x36e   : > { %v732_v50 = vsel %vm508_vm3, %v727_v49, 0 }
 0x370   : > { %v3703_v41 = vpop.eup %3060 }
 0x371   : > { %v501_v43 = vpack.c.bf16 %v3703_v41, %v3703_v41 }
 0x373   : > { %2738 = vmatmul.mubr.msk.bf16.vlgmr.msra.gmra.mrb[4].mxu1 %vm386_vm2, %v501_v43 }
 0x374   : > { %v3709_v45 = vpop.eup %3062  ;;  %2748 = vmatpush3.bf16.xpose.msra.mxu1 %v612_v44  ;;  %2749 = vmatprep.mubr.msk.bf16.mxu1 %vm3355_vm0, %v3354_v0 }
 0x375   : > { %v502_v46 = vpack.c.bf16 %v3709_v45, %v3709_v45  ;;  %2759 = vmatprep.subr.bf16.mxu1 %v3354_v0 }
 0x377   : > { %2744 = vmatmul.mubr.msk.bf16.vlgmr.msra.gmra.mrb[8].mxu0 %vm386_vm2, %v502_v46 }
 0x378   : > { %2754 = vmatpush3.bf16.xpose.msra.mxu0 %v662_v48  ;;  %2755 = vmatprep.mubr.msk.bf16.mxu0 %vm3355_vm0, %v3354_v0 }
 0x379   : > { %2765 = vmatprep.subr.bf16.mxu0 %v3354_v0 }
 0x37b   : > { %2750 = vmatmul.mubr.msk.bf16.vlgmr.msra.gmra.mrb[8].mxu1 %vm386_vm2, %v605_v47 }
 0x37c   : > { %2760 = vmatpush3.bf16.msra.mxu1 %v732_v50  ;;  %2761 = vmatprep.mubr.msk.bf16.mxu1 %vm3355_vm0, %v3354_v0 }
 0x37d   : > { %2771 = vmatprep.subr.bf16.mxu1 %v3354_v0 }
 0x37f   : > { %2756 = vmatmul.mubr.msk.bf16.vlgmr.msra.gmra.mrb[12].mxu0 %vm386_vm2, %v655_v42 }
 0x380   : > { %2766 = vmatpush3.bf16.msra.mxu0 %v780_v52  ;;  %2767 = vmatprep.mubr.msk.bf16.mxu0 %vm3355_vm0, %v3354_v0 }
 0x381   : > { %2777 = vmatprep.subr.bf16.mxu0 %v3354_v0 }
 0x446   : > { %v3731_v53 = vpop.f32.mrb[4].mxu1 }
 0x447   : > { %v2739_v54 = vpop.f32.mrb[5].mxu1 }
 0x448   : > { %v549_v55 = vpop.f32.mrb[6].mxu1 }
 0x449   : > { %v2740_v56 = vpop.f32.mrb[7].mxu1 }
 0x44a   : > { %v3733_v57 = vpop.f32.mrb[8].mxu0 }
 0x44b   : > { %v2745_v58 = vpop.f32.mrb[9].mxu0 }
 0x44c   : > { %v597_v59 = vpop.f32.mrb[10].mxu0 }
 0x44d   : > { %v2746_v60 = vpop.f32.mrb[11].mxu0 }
 0x44e   : > { %v648_v61 = vpop.f32.mrb[8].mxu1 }
 0x44f   : > { %v2751_v62 = vpop.f32.mrb[9].mxu1  ;;  %v704_v63 = vsel %vm386_vm2, %v648_v61, -inf }
 0x450   : > { %705 = vmax.xlane.f32.xlu0 %v704_v63  ;;  %v651_v1 = vpop.f32.mrb[10].mxu1 }
 0x451   : > { %v2752_v2 = vpop.f32.mrb[11].mxu1 }
 0x452   : > { %v698_v3 = vpop.f32.mrb[12].mxu0 }
 0x453   : > { %v2757_v4 = vpop.f32.mrb[13].mxu0  ;;  %v707_v6 = vsel %vm386_vm2, %v698_v3, -inf }
 0x454   : > { %708 = vmax.xlane.f32.xlu1 %v707_v6  ;;  %v701_v7 = vpop.f32.mrb[14].mxu0 }
 0x455   : > { %v2758_v8 = vpop.f32.mrb[15].mxu0 }
 0x465   : > { %883 = vrot.lane.b32.xlu1 %v3661_v13, %s3361_s17 }
 0x466   : > { %833 = vrot.lane.b32.xlu0 %v3665_v14, %s3361_s17 }
 0x469   : > { %881 = vrot.lane.b32.xlu1 %v3661_v13, %s3362_s15 }
 0x46a   : > { %831 = vrot.lane.b32.xlu0 %v3665_v14, %s3362_s15 }
 0x46d   : > { %953 = vrot.lane.b32.xlu1 %v3665_v14, %s3363_s9 }
 0x46e   : > { %1001 = vrot.lane.b32.xlu0 %v3661_v13, %s3363_s9 }
 0x4dd   : > { %v706_v9 = vpop.xlane.xlu0 %705 }
 0x4de   : > { %v710_v10 = vsub.f32 %v648_v61, %v706_v9 }
 0x4e0   : > { %v712_v11 = vmul.f32 1.442695, %v710_v10 }
 0x4e1   : > { %v709_v12 = vpop.xlane.xlu1 %708  ;;  %v834_v19 = vpop.permute.xlu0 %833 }
 0x4e2   : > { %3064 = vpow2.f32 %v712_v11  ;;  %v711_v15 = vsub.f32 %v698_v3, %v709_v12  ;;  %v839_v22 = vsel %vm386_vm2, %v834_v19, 0 }
 0x4e4   : > { %v714_v16 = vmul.f32 1.442695, %v711_v15 }
 0x4e5   : > { %v884_v17 = vpop.permute.xlu1 %883  ;;  %v832_v25 = vpop.permute.xlu0 %831 }
 0x4e6   : > { %3066 = vpow2.f32 %v714_v16  ;;  %v889_v26 = vsel %vm386_vm2, %v884_v17, 0 }
 0x4e9   : > { %v882_v21 = vpop.permute.xlu1 %881  ;;  %v1002_v29 = vpop.permute.xlu0 %1001 }
 0x4ea   : > { %v1007_v30 = vsel %vm508_vm3, %v1002_v29, 0 }
 0x4ec   : > { %v3749_v18 = vpop.eup %3064 }
 0x4ed   : > { %v724_v20 = vpack.c.bf16 %v3749_v18, %v3749_v18  ;;  %v954_v27 = vpop.permute.xlu1 %953  ;;  %v716_v29 = vsel %vm386_vm2, %v3749_v18, 0.0 }
 0x4ee   : > { %v959_v28 = vsel %vm508_vm3, %v954_v27, 0 }
 0x4ef   : > { %2762 = vmatmul.mubr.msk.bf16.vlgmr.msra.gmra.mrb[12].mxu1 %vm386_vm2, %v724_v20 }
 0x4f0   : > { %v3755_v23 = vpop.eup %3066  ;;  %2772 = vmatpush3.bf16.xpose.msra.mxu1 %v839_v22  ;;  %2773 = vmatprep.mubr.msk.bf16.mxu1 %vm3355_vm0, %v3354_v0 }
 0x4f1   : > { %v725_v24 = vpack.c.bf16 %v3755_v23, %v3755_v23  ;;  %2783 = vmatprep.subr.bf16.mxu1 %v3354_v0 }
 0x4f3   : > { %2768 = vmatmul.mubr.msk.bf16.vlgmr.msra.gmra.mrb[16].mxu0 %vm386_vm2, %v725_v24 }
 0x4f4   : > { %2778 = vmatpush3.bf16.xpose.msra.mxu0 %v889_v26  ;;  %2779 = vmatprep.mubr.msk.bf16.mxu0 %vm3355_vm0, %v3354_v0 }
 0x4f5   : > { %2789 = vmatprep.subr.bf16.mxu0 %v3354_v0 }
 0x4f7   : > { %2774 = vmatmul.mubr.msk.bf16.vlgmr.msra.gmra.mrb[16].mxu1 %vm386_vm2, %v832_v25 }
 0x4f8   : > { %2784 = vmatpush3.bf16.msra.mxu1 %v959_v28  ;;  %2785 = vmatprep.mubr.msk.bf16.mxu1 %vm3355_vm0, %v3354_v0 }
 0x4f9   : > { %2795 = vmatprep.subr.bf16.mxu1 %v3354_v0 }
 0x4fb   : > { %2780 = vmatmul.mubr.msk.bf16.vlgmr.msra.gmra.mrb[20].mxu0 %vm386_vm2, %v882_v21 }
 0x4fc   : > { %2790 = vmatpush3.bf16.msra.mxu0 %v1007_v30  ;;  %2791 = vmatprep.mubr.msk.bf16.mxu0 %vm3355_vm0, %v3354_v0 }
 0x4fd   : > { %2801 = vmatprep.subr.bf16.mxu0 %v3354_v0 }
 0x5c2   : > { %v3777_v31 = vpop.f32.mrb[12].mxu1 }
 0x5c3   : > { %v2763_v32 = vpop.f32.mrb[13].mxu1 }
 0x5c4   : > { %v771_v33 = vpop.f32.mrb[14].mxu1 }
 0x5c5   : > { %v2764_v34 = vpop.f32.mrb[15].mxu1  ;;  %v719_v33 = vsel %vm386_vm2, %v3755_v23, 0.0 }
 0x5c6   : > { %v3779_v35 = vpop.f32.mrb[16].mxu0 }
 0x5c7   : > { %v2769_v36 = vpop.f32.mrb[17].mxu0 }
 0x5c8   : > { %v819_v37 = vpop.f32.mrb[18].mxu0 }
 0x5c9   : > { %v2770_v38 = vpop.f32.mrb[19].mxu0 }
 0x5ca   : > { %v875_v39 = vpop.f32.mrb[16].mxu1 }
 0x5cb   : > { %v2775_v40 = vpop.f32.mrb[17].mxu1  ;;  %v931_v42 = vsel %vm386_vm2, %v875_v39, -inf }
 0x5cc   : > { %932 = vmax.xlane.f32.xlu0 %v931_v42  ;;  %v878_v43 = vpop.f32.mrb[18].mxu1 }
 0x5cd   : > { %v2776_v44 = vpop.f32.mrb[19].mxu1 }
 0x5ce   : > { %v925_v46 = vpop.f32.mrb[20].mxu0 }
 0x5cf   : > { %v2781_v47 = vpop.f32.mrb[21].mxu0  ;;  %v934_v48 = vsel %vm386_vm2, %v925_v46, -inf }
 0x5d0   : > { %935 = vmax.xlane.f32.xlu1 %v934_v48  ;;  %v928_v49 = vpop.f32.mrb[22].mxu0  ;;  %v493_v47 = vsel %vm386_vm2, %v3703_v41, 0.0 }
 0x5d1   : > { %v2782_v50 = vpop.f32.mrb[23].mxu0 }
 0x5d2   : > { %v3055_v50 = vld [vmem:[#allocation6 + $0x18] sm:$0xff]  }
 0x5e1   : > { %1110 = vrot.lane.b32.xlu1 %v3661_v13, %s3364_s23 }
 0x5e2   : > { %1060 = vrot.lane.b32.xlu0 %v3665_v14, %s3364_s23 }
 0x5e5   : > { %1108 = vrot.lane.b32.xlu1 %v3661_v13, %s3365_s7 }
 0x5e6   : > { %1058 = vrot.lane.b32.xlu0 %v3665_v14, %s3365_s7 }
 0x659   : > { %v933_v51 = vpop.xlane.xlu0 %932 }
 0x65a   : > { %v937_v52 = vsub.f32 %v875_v39, %v933_v51  ;;  %v496_v51 = vsel %vm386_vm2, %v3709_v45, 0.0 }
 0x65c   : > { %v939_v54 = vmul.f32 1.442695, %v937_v52 }
 0x65d   : > { %v936_v55 = vpop.xlane.xlu1 %935  ;;  %v1061_v60 = vpop.permute.xlu0 %1060 }
 0x65e   : > { %3068 = vpow2.f32 %v939_v54  ;;  %v938_v56 = vsub.f32 %v925_v46, %v936_v55  ;;  %v1066_v62 = vsel %vm386_vm2, %v1061_v60, 0  ;;  %v3054_v46 = vld [vmem:[#allocation6 + $0x10] sm:$0xff]  }
 0x660   : > { %v941_v58 = vmul.f32 1.442695, %v938_v56 }
 0x661   : > { %v1111_v1 = vpop.permute.xlu1 %1110  ;;  %v1059_v4 = vpop.permute.xlu0 %1058 }
 0x662   : > { %3070 = vpow2.f32 %v941_v58  ;;  %v1116_v3 = vsel %vm386_vm2, %v1111_v1, 0 }
 0x665   : > { %v1109_v6 = vpop.permute.xlu1 %1108 }
 0x668   : > { %v3069_v59 = vpop.eup %3068 }
 0x669   : > { %v951_v61 = vpack.c.bf16 %v3069_v59, %v3069_v59  ;;  %v943_v30 = vsel %vm386_vm2, %v3069_v59, 0.0 }
 0x66b   : > { %2786 = vmatmul.mubr.msk.bf16.vlgmr.msra.gmra.mrb[20].mxu1 %vm386_vm2, %v951_v61 }
 0x66c   : > { %v3071_v63 = vpop.eup %3070  ;;  %2796 = vmatpush3.bf16.xpose.msra.mxu1 %v1066_v62  ;;  %2797 = vmatprep.mubr.msk.bf16.mxu1 %vm3355_vm0, %v3354_v0 }
 0x66d   : > { %v952_v2 = vpack.c.bf16 %v3071_v63, %v3071_v63  ;;  %2807 = vmatprep.subr.bf16.mxu1 %v3354_v0  ;;  %v946_v32 = vsel %vm386_vm2, %v3071_v63, 0.0 }
 0x66f   : > { %2792 = vmatmul.mubr.msk.bf16.vlgmr.msra.gmra.mrb[24].mxu0 %vm386_vm2, %v952_v2 }
 0x670   : > { %2802 = vmatpush3.bf16.xpose.msra.mxu0 %v1116_v3  ;;  %2803 = vmatprep.mubr.msk.bf16.mxu0 %vm3355_vm0, %v3354_v0 }
 0x671   : > { %2813 = vmatprep.subr.bf16.mxu0 %v3354_v0 }
 0x673   : > { %2798 = vmatmul.mubr.msk.bf16.vlgmr.msra.gmra.mrb[24].mxu1 %vm386_vm2, %v1059_v4  ;;  %v3056_v4 = vld [vmem:[#allocation8] sm:$0xff]  }
 0x674   : > { %2809 = vmatprep.mubr.msk.bf16.mxu1 %vm3355_vm0, %v3354_v0 }
 0x677   : > { %2804 = vmatmul.mubr.msk.bf16.vlgmr.msra.gmra.mrb[28].mxu0 %vm386_vm2, %v1109_v6 }
 0x678   : > { %2815 = vmatprep.mubr.msk.bf16.mxu0 %vm3355_vm0, %v3354_v0 }
 0x73e   : > { %v3807_v7 = vpop.f32.mrb[20].mxu1 }
 0x73f   : > { %v2787_v8 = vpop.f32.mrb[21].mxu1 }
 0x740   : > { %v998_v9 = vpop.f32.mrb[22].mxu1 }
 0x741   : > { %v2788_v10 = vpop.f32.mrb[23].mxu1 }
 0x742   : > { %v3809_v11 = vpop.f32.mrb[24].mxu0 }
 0x743   : > { %v2793_v12 = vpop.f32.mrb[25].mxu0 }
 0x744   : > { %v1046_v15 = vpop.f32.mrb[26].mxu0 }
 0x745   : > { %v2794_v16 = vpop.f32.mrb[27].mxu0 }
 0x746   : > { %v1102_v17 = vpop.f32.mrb[24].mxu1 }
 0x747   : > { %v2799_v19 = vpop.f32.mrb[25].mxu1  ;;  %v1158_v20 = vsel %vm386_vm2, %v1102_v17, -inf }
 0x748   : > { %1159 = vmax.xlane.f32.xlu0 %v1158_v20  ;;  %v1105_v21 = vpop.f32.mrb[26].mxu1 }
 0x749   : > { %v2800_v22 = vpop.f32.mrb[27].mxu1 }
 0x74a   : > { %v1152_v24 = vpop.f32.mrb[28].mxu0 }
 0x74b   : > { %v2805_v25 = vpop.f32.mrb[29].mxu0  ;;  %v1161_v26 = vsel %vm386_vm2, %v1152_v24, -inf }
 0x74c   : > { %1162 = vmax.xlane.f32.xlu1 %v1161_v26  ;;  %v1155_v27 = vpop.f32.mrb[30].mxu0 }
 0x74d   : > { %v2806_v28 = vpop.f32.mrb[31].mxu0 }
 0x75d   : > { %1180 = vrot.lane.b32.xlu1 %v3665_v14, %s3366_s16 }
 0x75e   : > { %1228 = vrot.lane.b32.xlu0 %v3661_v13, %s3366_s16 }
 0x761   : > { %1382 = vrot.lane.b32.xlu1 %v3654_v5, %s3356_s24 }
 0x77d   : > { %717 = vadd.xlane.f32.xlu0 %v716_v29 }
 0x781   : > { %944 = vadd.xlane.f32.xlu0 %v943_v30 }
 0x785   : > { %947 = vadd.xlane.f32.xlu0 %v946_v32  ;;  %720 = vadd.xlane.f32.xlu1 %v719_v33  ;;  %v2598_v32 = vld [vmem:[#allocation9 + $0x1] ss:$0 sm:$0xff] }
 0x7d5   : > { %v1160_v14 = vpop.xlane.xlu0 %1159 }
 0x7d6   : > { %v1164_v34 = vsub.f32 %v1102_v17, %v1160_v14  ;;  %v3057_v17 = vld [vmem:[#allocation8 + $0x8] sm:$0xff]  }
 0x7d8   : > { %v1166_v13 = vmul.f32 1.442695, %v1164_v34 }
 0x7d9   : > { %v1229_v36 = vpop.permute.xlu0 %1228  ;;  %v1163_v37 = vpop.xlane.xlu1 %1162 }
 0x7da   : > { %3072 = vpow2.f32 %v1166_v13  ;;  %v1234_v5 = vsel %vm508_vm3, %v1229_v36, 0  ;;  %v1165_v18 = vsub.f32 %v1152_v24, %v1163_v37 }
 0x7db   : > { %2814 = vmatpush3.bf16.msra.mxu0 %v1234_v5 }
 0x7dc   : > { %v1168_v38 = vmul.f32 1.442695, %v1165_v18  ;;  %2827 = vmatprep.subr.bf16.mxu0 %v3354_v0 }
 0x7dd   : > { %v1181_v39 = vpop.permute.xlu1 %1180 }
 0x7de   : > { %3074 = vpow2.f32 %v1168_v38  ;;  %v1186_v40 = vsel %vm508_vm3, %v1181_v39, 0 }
 0x7df   : > { %2808 = vmatpush3.bf16.msra.mxu1 %v1186_v40 }
 0x7e0   : > { %2819 = vmatprep.subr.bf16.mxu1 %v3354_v0 }
 0x7e1   : > { %v1383_v41 = vpop.permute.xlu1 %1382 }
 0x7e4   : > { %v3073_v23 = vpop.eup %3072 }
 0x7e5   : > { %v1170_v42 = vsel %vm386_vm2, %v3073_v23, 0.0  ;;  %v1178_v43 = vpack.c.bf16 %v3073_v23, %v3073_v23 }
 0x7e6   : > { %1171 = vadd.xlane.f32.xlu1 %v1170_v42 }
 0x7e7   : > { %2810 = vmatmul.mubr.msk.bf16.vlgmr.msra.gmra.mrb[28].mxu1 %vm386_vm2, %v1178_v43 }
 0x7e8   : > { %v3075_v44 = vpop.eup %3074  ;;  %2823 = vmatprep.mubr.msk.bf16.mxu1 %vm3355_vm0, %v3354_v0  ;;  %2820 = vmatpush3.bf16.msra.mxu1 %v3056_v4 }
 0x7e9   : > { %v1173_v48 = vsel %vm386_vm2, %v3075_v44, 0.0  ;;  %v1179_v49 = vpack.c.bf16 %v3075_v44, %v3075_v44  ;;  %2821 = vmatprep.subr.bf16.mxu1 %v3354_v0 }
 0x7ea   : > { %494 = vadd.xlane.f32.xlu1 %v493_v47  ;;  %1174 = vadd.xlane.f32.xlu0 %v1173_v48 }
 0x7eb   : > { %2816 = vmatmul.mubr.msk.bf16.vlgmr.msra.gmra.mrb[32].mxu0 %vm386_vm2, %v1179_v49  ;;  %v2594_v49 = vld [vmem:[#allocation11] ss:$0 sm:$0xff] }
 0x7ec   : > { %2828 = vmatpush3.bf16.msra.mxu0 %v3054_v46  ;;  %2831 = vmatprep.mubr.msk.bf16.mxu0 %vm3355_vm0, %v3354_v0 }
 0x7ed   : > { %2829 = vmatprep.subr.bf16.mxu0 %v3354_v0  ;;  %2822 = vmatpush3.bf16.msra.mxu1 %v3057_v17 }
 0x7ee   : > { %497 = vadd.xlane.f32.xlu0 %v496_v51  ;;  %2835 = vmatprep.subr.bf16.mxu1 %v3354_v0 }
 0x7f0   : > { %2830 = vmatpush3.bf16.msra.mxu0 %v3055_v50 }
 0x7f1   : > { %2841 = vmatprep.subr.bf16.mxu0 %v3354_v0 }
 0x7f3   : > { %2832 = vmatmul.mubr.msk.bf16.vlgmr.msra.gmra.mrb[36].mxu0 %vm333_vm1, %v1383_v41 }
 0x7f4   : > { %2843 = vmatprep.mubr.msk.bf16.mxu0 %vm3355_vm0, %v3354_v0 }
 0x80a   : > { %v718_v52 = vpop.xlane.xlu0 %717 }
 0x80e   : > { %v945_v54 = vpop.xlane.xlu0 %944 }
 0x80f   : > { %3076 = vrcp.f32 %v945_v54 }
 0x810   : > { %3078 = vrcp.f32 %v718_v52 }
 0x812   : > { %v948_v55 = vpop.xlane.xlu0 %947  ;;  %v721_v56 = vpop.xlane.xlu1 %720 }
 0x813   : > { %3080 = vrcp.f32 %v948_v55 }
 0x814   : > { %3082 = vrcp.f32 %v721_v56 }
 0x819   : > { %v3077_v45 = vpop.eup %3076 }
 0x81a   : > { %v3079_v58 = vpop.eup %3078  ;;  %v1049_v61 = vmul.f32 %v3077_v45, %v3807_v7 }
 0x81b   : > { %v822_v63 = vmul.f32 %v3079_v58, %v3777_v31 }
 0x81d   : > { %v3081_v59 = vpop.eup %3080 }
 0x81e   : > { %v3083_v60 = vpop.eup %3082  ;;  %v1050_v62 = vmul.f32 %v3081_v59, %v3809_v11 }
 0x81f   : > { %v823_v1 = vmul.f32 %v3083_v60, %v3779_v35 }
 0x820   : > { %v1051_v2 = vpack.c.bf16 %v1050_v62, %v1049_v61 }
 0x821   : > { %v824_v3 = vpack.c.bf16 %v823_v1, %v822_v63 }
 0x822   : > { %1053 = vrot.lane.b32.xlu0 %v1051_v2, %s3367_s12 }
 0x823   : > { %826 = vrot.lane.b32.xlu1 %v824_v3, %s3368_s13 }
 0x873   : > { %v1172_v6 = vpop.xlane.xlu1 %1171 }
 0x877   : > { %v1175_v7 = vpop.xlane.xlu0 %1174  ;;  %v495_v8 = vpop.xlane.xlu1 %494 }
 0x878   : > { %3084 = vrcp.f32 %v495_v8 }
 0x87b   : > { %v498_v9 = vpop.xlane.xlu0 %497 }
 0x87c   : > { %3086 = vrcp.f32 %v498_v9 }
 0x87d   : > { %3088 = vrcp.f32 %v1172_v6 }
 0x87e   : > { %3090 = vrcp.f32 %v1175_v7 }
 0x882   : > { %v3085_v31 = vpop.eup %3084 }
 0x883   : > { %v600_v10 = vmul.f32 %v3085_v31, %v3731_v53 }
 0x886   : > { %v3087_v35 = vpop.eup %3086 }
 0x887   : > { %v601_v11 = vmul.f32 %v3087_v35, %v3733_v57  ;;  %v3089_v20 = vpop.eup %3088 }
 0x888   : > { %v3091_v22 = vpop.eup %3090 }
 0x889   : > { %v602_v12 = vpack.c.bf16 %v601_v11, %v600_v10 }
 0x88b   : > { %603 = vst.msk [vmem:[#allocation2] sm:$0xff] %vm386_vm2, %v602_v12 }
 0x894   : > { %v1054_v15 = vpop.permute.xlu0 %1053 }
 0x895   : > { %v827_v16 = vpop.permute.xlu1 %826 }
 0x896   : > { %830 = vst.msk [vmem:[#allocation2] sm:$0xff] %vm829_vm4, %v827_v16 }
 0x897   : > { %1057 = vst.msk [vmem:[#allocation2] sm:$0xff] %vm1056_vm5, %v1054_v15 }
 0x8ba   : > { %v1222_v53 = vpop.f32.mrb[28].mxu1 }
 0x8bb   : > { %v2811_v19 = vpop.f32.mrb[29].mxu1  ;;  %v1276_v25 = vmul.f32 %v3089_v20, %v1222_v53 }
 0x8bc   : > { %v1225_v57 = vpop.f32.mrb[30].mxu1 }
 0x8bd   : > { %v2812_v21 = vpop.f32.mrb[31].mxu1 }
 0x8be   : > { %v1270_v24 = vpop.f32.mrb[32].mxu0 }
 0x8bf   : > { %v1277_v26 = vmul.f32 %v3091_v22, %v1270_v24  ;;  %v2817_v27 = vpop.f32.mrb[33].mxu0 }
 0x8c0   : > { %v1273_v28 = vpop.f32.mrb[34].mxu0 }
 0x8c1   : > { %v1278_v29 = vpack.c.bf16 %v1277_v26, %v1276_v25  ;;  %v2818_v30 = vpop.f32.mrb[35].mxu0 }
 0x8c3   : > { %1280 = vrot.lane.b32.xlu1 %v1278_v29, %s3369_s14 }
 0x8c6   : > { %v1433_v33 = vpop.f32.mrb[36].mxu0 }
 0x8c7   : > { %v1434_v14 = vadd.f32 %v2598_v32, %v1433_v33  ;;  %v2833_v34 = vpop.f32.mrb[37].mxu0 }
 0x8c8   : > { %v1436_v13 = vpop.f32.mrb[38].mxu0 }
 0x8c9   : > { %v3860_v36 = vpack.c.bf16 %v1434_v14, %v1434_v14  ;;  %v1437_v37 = vadd.f32 %v2598_v32, %v1436_v13  ;;  %v2834_v5 = vpop.f32.mrb[39].mxu0 }
 0x8cb   : > { %v3862_v18 = vpack.c.bf16 %v1437_v37, %v1437_v37  ;;  %1446 = vrot.lane.b32.xlu1 %v3860_v36, %s3356_s24 }
 0x8cd   : > { %1494 = vrot.lane.b32.xlu0 %v3862_v18, %s3356_s24  ;;  %s3893_s24 = scalar_lea.vmem [#allocation12], %s2570_s11 }
 0x8cf   : > { %1612 = vrot.lane.b32.xlu1 %v3862_v18, %s3357_s26 }
 0x8d1   : > { %1564 = vrot.lane.b32.xlu0 %v3860_v36, %s3357_s26 }
 0x935   : > { %v1281_v38 = vpop.permute.xlu1 %1280 }
 0x936   : > { %1284 = vst.msk [vmem:[#allocation2] sm:$0xff] %vm1283_vm6, %v1281_v38 }
 0x93d   : > { %v1447_v39 = vpop.permute.xlu1 %1446  ;;  %v1285_v40 = vld [vmem:[#allocation2] sm:$0xff] }
 0x93e   : > { %v1452_v23 = vsel %vm386_vm2, %v1447_v39, 0  ;;  %2824 = vmatmul.mubr.msk.bf16.vlgmr.msra.gmra.mrb[32].mxu1 %vm333_vm1, %v1285_v40 }
 0x93f   : > { %2836 = vmatpush3.bf16.xpose.msra.mxu1 %v1452_v23  ;;  %v1495_v42 = vpop.permute.xlu0 %1494  ;;  %2837 = vmatprep.mubr.msk.bf16.mxu1 %vm3355_vm0, %v3354_v0 }
 0x940   : > { %v1500_v43 = vsel %vm386_vm2, %v1495_v42, 0  ;;  %2847 = vmatprep.subr.bf16.mxu1 %v3354_v0 }
 0x941   : > { %2842 = vmatpush3.bf16.xpose.msra.mxu0 %v1500_v43  ;;  %v1613_v46 = vpop.permute.xlu1 %1612 }
 0x942   : > { %2853 = vmatprep.subr.bf16.mxu0 %v3354_v0  ;;  %v1618_v48 = vsel %vm508_vm3, %v1613_v46, 0 }
 0x943   : > { %v1565_v44 = vpop.permute.xlu0 %1564 }
 0x944   : > { %v1570_v47 = vsel %vm508_vm3, %v1565_v44, 0 }
 0x946   : > { %2838 = vmatmul.mubr.msk.bf16.vlgmr.msra.gmra.mrb[36].mxu1 %vm386_vm2, %v3860_v36 }
 0x947   : > { %2848 = vmatpush3.bf16.msra.mxu1 %v1570_v47  ;;  %2849 = vmatprep.mubr.msk.bf16.mxu1 %vm3355_vm0, %v3354_v0 }
 0x948   : > { %2844 = vmatmul.mubr.msk.bf16.vlgmr.msra.gmra.mrb[40].mxu0 %vm386_vm2, %v3862_v18  ;;  %2859 = vmatprep.subr.bf16.mxu1 %v3354_v0 }
 0x949   : > { %2854 = vmatpush3.bf16.msra.mxu0 %v1618_v48  ;;  %2855 = vmatprep.mubr.msk.bf16.mxu0 %vm3355_vm0, %v3354_v0 }
 0x94a   : > { %2865 = vmatprep.subr.bf16.mxu0 %v3354_v0 }
 0xa11   : > { %v1346_v50 = vpop.f32.mrb[32].mxu1 }
 0xa12   : > { %v1347_v51 = vadd.f32 %v2594_v49, %v1346_v50  ;;  %v2825_v41 = vpop.f32.mrb[33].mxu1 }
 0xa13   : > { %v1349_v52 = vpop.f32.mrb[34].mxu1 }
 0xa14   : > { %v1353_v54 = vmul.f32 0.5, %v1347_v51  ;;  %v1350_v55 = vadd.f32 %v2594_v49, %v1349_v52  ;;  %v2826_v56 = vpop.f32.mrb[35].mxu1 }
 0xa16   : > { %v1355_v45 = vpack.c.bf16 %v1353_v54, %v1353_v54  ;;  %v1354_v58 = vmul.f32 0.5, %v1350_v55 }
 0xa18   : > { %1358 = vst.msk [vmem:[%s3893_s24] sm:$0xf] %vm1357_vm7, %v1355_v45  ;;  %v1356_v59 = vpack.c.bf16 %v1354_v58, %v1354_v58 }
 0xa19   : > { %v1488_v60 = vpop.f32.mrb[36].mxu1 }
 0xa1a   : > { %1359 = vst.msk [vmem:[%s3893_s24 + $0x4] sm:$0xf] %vm1357_vm7, %v1356_v59  ;;  %v2839_v61 = vpop.f32.mrb[37].mxu1  ;;  %v1542_v62 = vsel %vm386_vm2, %v1488_v60, -inf }
 0xa1b   : > { %v1491_v63 = vpop.f32.mrb[38].mxu1  ;;  %1543 = vmax.xlane.f32.xlu1 %v1542_v62  ;;  %v1536_v1 = vpop.f32.mrb[40].mxu0 }
 0xa1c   : > { %v2840_v2 = vpop.f32.mrb[39].mxu1  ;;  %v2845_v3 = vpop.f32.mrb[41].mxu0  ;;  %v1545_v4 = vsel %vm386_vm2, %v1536_v1, -inf }
 0xa1d   : > { %1546 = vmax.xlane.f32.xlu0 %v1545_v4  ;;  %v1539_v6 = vpop.f32.mrb[42].mxu0 }
 0xa1e   : > { %v2846_v7 = vpop.f32.mrb[43].mxu0 }
 0xa2c   : > { %1666 = vrot.lane.b32.xlu1 %v3860_v36, %s3358_s28 }
 0xa30   : > { %1664 = vrot.lane.b32.xlu1 %v3860_v36, %s3359_s6 }
 0xa33   : > { %1716 = vrot.lane.b32.xlu0 %v3862_v18, %s3358_s28  ;;  %s3370_s28 = smov 32  }
 0xa34   : > { %1834 = vrot.lane.b32.xlu1 %v3862_v18, %s3360_s27 }
 0xa37   : > { %1714 = vrot.lane.b32.xlu0 %v3862_v18, %s3359_s6  ;;  %s2628_s6 = sshll.u32 %s3425_s22, 6  ;;  %s3371_s22 = smov [#allocation12]  }
 0xa3b   : > { %1786 = vrot.lane.b32.xlu0 %v3860_v36, %s3360_s27  ;;  %s2444_s27 = sshll.u32 %s3893_s24, 4  ;;  %s4066_s27 = int_to_ptr.vmem [resolvable:$true] %s2444_s27 }
 0xaa8   : > { %v1544_v8 = vpop.xlane.xlu1 %1543 }
 0xaa9   : > { %v1548_v9 = vsub.f32 %v1488_v60, %v1544_v8 }
 0xaaa   : > { %v1547_v31 = vpop.xlane.xlu0 %1546 }
 0xaab   : > { %v1550_v35 = vmul.f32 1.442695, %v1548_v9  ;;  %v1549_v10 = vsub.f32 %v1536_v1, %v1547_v31 }
 0xaac   : > { %v1667_v15 = vpop.permute.xlu1 %1666 }
 0xaad   : > { %3092 = vpow2.f32 %v1550_v35  ;;  %v1552_v11 = vmul.f32 1.442695, %v1549_v10  ;;  %v1672_v57 = vsel %vm386_vm2, %v1667_v15, 0 }
 0xaae   : > { %v1717_v12 = vpop.permute.xlu0 %1716 }
 0xaaf   : > { %3094 = vpow2.f32 %v1552_v11  ;;  %v1722_v22 = vsel %vm386_vm2, %v1717_v12, 0 }
 0xab0   : > { %v1665_v21 = vpop.permute.xlu1 %1664 }
 0xab2   : > { %v1715_v19 = vpop.permute.xlu0 %1714 }
 0xab4   : > { %v1835_v25 = vpop.permute.xlu1 %1834 }
 0xab5   : > { %v1840_v27 = vsel %vm508_vm3, %v1835_v25, 0 }
 0xab6   : > { %v1787_v24 = vpop.permute.xlu0 %1786 }
 0xab7   : > { %v3911_v16 = vpop.eup %3092  ;;  %v1792_v26 = vsel %vm508_vm3, %v1787_v24, 0 }
 0xab8   : > { %v1562_v17 = vpack.c.bf16 %v3911_v16, %v3911_v16 }
 0xab9   : > { %v3915_v53 = vpop.eup %3094 }
 0xaba   : > { %2850 = vmatmul.mubr.msk.bf16.vlgmr.msra.gmra.mrb[40].mxu1 %vm386_vm2, %v1562_v17  ;;  %v1563_v20 = vpack.c.bf16 %v3915_v53, %v3915_v53 }
 0xabb   : > { %2860 = vmatpush3.bf16.xpose.msra.mxu1 %v1672_v57  ;;  %2861 = vmatprep.mubr.msk.bf16.mxu1 %vm3355_vm0, %v3354_v0 }
 0xabc   : > { %2856 = vmatmul.mubr.msk.bf16.vlgmr.msra.gmra.mrb[44].mxu0 %vm386_vm2, %v1563_v20  ;;  %2871 = vmatprep.subr.bf16.mxu1 %v3354_v0 }
 0xabd   : > { %2866 = vmatpush3.bf16.xpose.msra.mxu0 %v1722_v22  ;;  %2867 = vmatprep.mubr.msk.bf16.mxu0 %vm3355_vm0, %v3354_v0 }
 0xabe   : > { %2877 = vmatprep.subr.bf16.mxu0 %v3354_v0 }
 0xac2   : > { %2862 = vmatmul.mubr.msk.bf16.vlgmr.msra.gmra.mrb[44].mxu1 %vm386_vm2, %v1665_v21 }
 0xac3   : > { %2872 = vmatpush3.bf16.msra.mxu1 %v1792_v26  ;;  %2873 = vmatprep.mubr.msk.bf16.mxu1 %vm3355_vm0, %v3354_v0 }
 0xac4   : > { %2868 = vmatmul.mubr.msk.bf16.vlgmr.msra.gmra.mrb[48].mxu0 %vm386_vm2, %v1715_v19  ;;  %2883 = vmatprep.subr.bf16.mxu1 %v3354_v0 }
 0xac5   : > { %2878 = vmatpush3.bf16.msra.mxu0 %v1840_v27  ;;  %2879 = vmatprep.mubr.msk.bf16.mxu0 %vm3355_vm0, %v3354_v0 }
 0xac6   : > { %2889 = vmatprep.subr.bf16.mxu0 %v3354_v0 }
 0xb8d   : > { %v3939_v28 = vpop.f32.mrb[40].mxu1 }
 0xb8e   : > { %v2851_v29 = vpop.f32.mrb[41].mxu1 }
 0xb8f   : > { %v1609_v30 = vpop.f32.mrb[42].mxu1  ;;  %v3941_v32 = vpop.f32.mrb[44].mxu0 }
 0xb90   : > { %v2852_v33 = vpop.f32.mrb[43].mxu1  ;;  %v2857_v14 = vpop.f32.mrb[45].mxu0 }
 0xb91   : > { %v1657_v34 = vpop.f32.mrb[46].mxu0 }
 0xb92   : > { %v2858_v13 = vpop.f32.mrb[47].mxu0 }
 0xb95   : > { %v1708_v37 = vpop.f32.mrb[44].mxu1 }
 0xb96   : > { %v2863_v5 = vpop.f32.mrb[45].mxu1  ;;  %v1764_v38 = vsel %vm386_vm2, %v1708_v37, -inf }
 0xb97   : > { %1765 = vmax.xlane.f32.xlu1 %v1764_v38  ;;  %v1711_v39 = vpop.f32.mrb[46].mxu1  ;;  %v1758_v40 = vpop.f32.mrb[48].mxu0 }
 0xb98   : > { %v2864_v23 = vpop.f32.mrb[47].mxu1  ;;  %v2869_v42 = vpop.f32.mrb[49].mxu0  ;;  %v1767_v43 = vsel %vm386_vm2, %v1758_v40, -inf }
 0xb99   : > { %1768 = vmax.xlane.f32.xlu0 %v1767_v43  ;;  %v1761_v44 = vpop.f32.mrb[50].mxu0 }
 0xb9a   : > { %v2870_v46 = vpop.f32.mrb[51].mxu0 }
 0xba8   : > { %1892 = vrot.lane.b32.xlu1 %v3860_v36, %s3361_s17 }
 0xbac   : > { %1890 = vrot.lane.b32.xlu1 %v3860_v36, %s3362_s15 }
 0xbaf   : > { %1942 = vrot.lane.b32.xlu0 %v3862_v18, %s3361_s17 }
 0xbb0   : > { %2060 = vrot.lane.b32.xlu1 %v3862_v18, %s3363_s9 }
 0xbb3   : > { %1940 = vrot.lane.b32.xlu0 %v3862_v18, %s3362_s15 }
 0xbb7   : > { %2012 = vrot.lane.b32.xlu0 %v3860_v36, %s3363_s9  ;;  %s4064_s9 = scalar_lea.hbm %s4118_s5, %s2628_s6 }
 0xc24   : > { %v1766_v47 = vpop.xlane.xlu1 %1765 }
 0xc25   : > { %v1770_v48 = vsub.f32 %v1708_v37, %v1766_v47 }
 0xc26   : > { %v1769_v49 = vpop.xlane.xlu0 %1768 }
 0xc27   : > { %v1772_v50 = vmul.f32 1.442695, %v1770_v48  ;;  %v1771_v51 = vsub.f32 %v1758_v40, %v1769_v49 }
 0xc28   : > { %v1893_v54 = vpop.permute.xlu1 %1892 }
 0xc29   : > { %3096 = vpow2.f32 %v1772_v50  ;;  %v1774_v41 = vmul.f32 1.442695, %v1771_v51  ;;  %v1898_v59 = vsel %vm386_vm2, %v1893_v54, 0 }
 0xc2a   : > { %v1943_v52 = vpop.permute.xlu0 %1942 }
 0xc2b   : > { %3098 = vpow2.f32 %v1774_v41  ;;  %v1948_v62 = vsel %vm386_vm2, %v1943_v52, 0 }
 0xc2c   : > { %v1891_v61 = vpop.permute.xlu1 %1890 }
 0xc2e   : > { %v1941_v58 = vpop.permute.xlu0 %1940 }
 0xc30   : > { %v2061_v1 = vpop.permute.xlu1 %2060 }
 0xc31   : > { %v2066_v3 = vsel %vm508_vm3, %v2061_v1, 0 }
 0xc32   : > { %v2013_v63 = vpop.permute.xlu0 %2012 }
 0xc33   : > { %v3957_v55 = vpop.eup %3096  ;;  %v2018_v2 = vsel %vm508_vm3, %v2013_v63, 0 }
 0xc34   : > { %v1784_v56 = vpack.c.bf16 %v3957_v55, %v3957_v55  ;;  %v1776_v1 = vsel %vm386_vm2, %v3957_v55, 0.0 }
 0xc35   : > { %v3961_v45 = vpop.eup %3098 }
 0xc36   : > { %2874 = vmatmul.mubr.msk.bf16.vlgmr.msra.gmra.mrb[48].mxu1 %vm386_vm2, %v1784_v56  ;;  %v1785_v60 = vpack.c.bf16 %v3961_v45, %v3961_v45 }
 0xc37   : > { %2884 = vmatpush3.bf16.xpose.msra.mxu1 %v1898_v59  ;;  %2885 = vmatprep.mubr.msk.bf16.mxu1 %vm3355_vm0, %v3354_v0 }
 0xc38   : > { %2880 = vmatmul.mubr.msk.bf16.vlgmr.msra.gmra.mrb[52].mxu0 %vm386_vm2, %v1785_v60  ;;  %2895 = vmatprep.subr.bf16.mxu1 %v3354_v0 }
 0xc39   : > { %2890 = vmatpush3.bf16.xpose.msra.mxu0 %v1948_v62  ;;  %2891 = vmatprep.mubr.msk.bf16.mxu0 %vm3355_vm0, %v3354_v0 }
 0xc3a   : > { %2901 = vmatprep.subr.bf16.mxu0 %v3354_v0 }
 0xc3e   : > { %2886 = vmatmul.mubr.msk.bf16.vlgmr.msra.gmra.mrb[52].mxu1 %vm386_vm2, %v1891_v61 }
 0xc3f   : > { %2896 = vmatpush3.bf16.msra.mxu1 %v2018_v2  ;;  %2897 = vmatprep.mubr.msk.bf16.mxu1 %vm3355_vm0, %v3354_v0  ;;  %v1779_v2 = vsel %vm386_vm2, %v3961_v45, 0.0 }
 0xc40   : > { %2892 = vmatmul.mubr.msk.bf16.vlgmr.msra.gmra.mrb[56].mxu0 %vm386_vm2, %v1941_v58  ;;  %2907 = vmatprep.subr.bf16.mxu1 %v3354_v0 }
 0xc41   : > { %2902 = vmatpush3.bf16.msra.mxu0 %v2066_v3  ;;  %2903 = vmatprep.mubr.msk.bf16.mxu0 %vm3355_vm0, %v3354_v0 }
 0xc42   : > { %2913 = vmatprep.subr.bf16.mxu0 %v3354_v0 }
 0xd09   : > { %v3985_v4 = vpop.f32.mrb[48].mxu1 }
 0xd0a   : > { %v2875_v6 = vpop.f32.mrb[49].mxu1 }
 0xd0b   : > { %v1831_v7 = vpop.f32.mrb[50].mxu1  ;;  %v3987_v8 = vpop.f32.mrb[52].mxu0 }
 0xd0c   : > { %v2876_v9 = vpop.f32.mrb[51].mxu1  ;;  %v2881_v31 = vpop.f32.mrb[53].mxu0 }
 0xd0d   : > { %v1879_v35 = vpop.f32.mrb[54].mxu0 }
 0xd0e   : > { %v2882_v10 = vpop.f32.mrb[55].mxu0 }
 0xd11   : > { %v1934_v11 = vpop.f32.mrb[52].mxu1 }
 0xd12   : > { %v2887_v12 = vpop.f32.mrb[53].mxu1  ;;  %v1990_v15 = vsel %vm386_vm2, %v1934_v11, -inf }
 0xd13   : > { %1991 = vmax.xlane.f32.xlu1 %v1990_v15  ;;  %v1937_v17 = vpop.f32.mrb[54].mxu1  ;;  %v1984_v19 = vpop.f32.mrb[56].mxu0 }
 0xd14   : > { %v2888_v57 = vpop.f32.mrb[55].mxu1  ;;  %v2893_v20 = vpop.f32.mrb[57].mxu0  ;;  %v1993_v21 = vsel %vm386_vm2, %v1984_v19, -inf }
 0xd15   : > { %1994 = vmax.xlane.f32.xlu0 %v1993_v21  ;;  %v1987_v22 = vpop.f32.mrb[58].mxu0  ;;  %v1554_v21 = vsel %vm386_vm2, %v3911_v16, 0.0 }
 0xd16   : > { %v2894_v24 = vpop.f32.mrb[59].mxu0  ;;  %v1557_v22 = vsel %vm386_vm2, %v3915_v53, 0.0 }
 0xd24   : > { %2118 = vrot.lane.b32.xlu1 %v3860_v36, %s3364_s23 }
 0xd28   : > { %2116 = vrot.lane.b32.xlu1 %v3860_v36, %s3365_s7 }
 0xd2b   : > { %2168 = vrot.lane.b32.xlu0 %v3862_v18, %s3364_s23  ;;  %s2432_s23 = scalar_lea.sflag [#allocation5], %s3631_s30 }
 0xd2f   : > { %2166 = vrot.lane.b32.xlu0 %v3862_v18, %s3365_s7  ;;  %s3266_s7 = scalar_lea.vmem %s4066_s27, 128 }
 0xd30   : > { %p3267_p10 = scmp.ne.s32.totalorder %s4066_s27, %s3266_s7 }
 0xd32   : > { %p3268_p5 = pnand %p3267_p10, %p3582_p3 }
 0xd34   : > { %p3269_p7 = pneg %p3268_p5 }
 0xda0   : > { %v1992_v25 = vpop.xlane.xlu1 %1991 }
 0xda1   : > { %v1996_v26 = vsub.f32 %v1934_v11, %v1992_v25 }
 0xda2   : > { %v1995_v27 = vpop.xlane.xlu0 %1994 }
 0xda3   : > { %v1998_v29 = vmul.f32 1.442695, %v1996_v26  ;;  %v1997_v30 = vsub.f32 %v1984_v19, %v1995_v27 }
 0xda4   : > { %v2119_v34 = vpop.permute.xlu1 %2118 }
 0xda5   : > { %3100 = vpow2.f32 %v1998_v29  ;;  %v2000_v33 = vmul.f32 1.442695, %v1997_v30  ;;  %v2124_v38 = vsel %vm386_vm2, %v2119_v34, 0 }
 0xda6   : > { %v2169_v5 = vpop.permute.xlu0 %2168 }
 0xda7   : > { %3102 = vpow2.f32 %v2000_v33  ;;  %v2174_v40 = vsel %vm386_vm2, %v2169_v5, 0 }
 0xda8   : > { %v2117_v23 = vpop.permute.xlu1 %2116 }
 0xdaa   : > { %v2167_v42 = vpop.permute.xlu0 %2166 }
 0xdaf   : > { %v3101_v14 = vpop.eup %3100 }
 0xdb0   : > { %v2010_v13 = vpack.c.bf16 %v3101_v14, %v3101_v14  ;;  %v2002_v6 = vsel %vm386_vm2, %v3101_v14, 0.0 }
 0xdb1   : > { %v3103_v37 = vpop.eup %3102 }
 0xdb2   : > { %2898 = vmatmul.mubr.msk.bf16.vlgmr.msra.gmra.mrb[56].mxu1 %vm386_vm2, %v2010_v13  ;;  %v2011_v39 = vpack.c.bf16 %v3103_v37, %v3103_v37  ;;  %v2005_v3 = vsel %vm386_vm2, %v3103_v37, 0.0 }
 0xdb3   : > { %2908 = vmatpush3.bf16.xpose.msra.mxu1 %v2124_v38  ;;  %2909 = vmatprep.mubr.msk.bf16.mxu1 %vm3355_vm0, %v3354_v0 }
 0xdb4   : > { %2904 = vmatmul.mubr.msk.bf16.vlgmr.msra.gmra.mrb[60].mxu0 %vm386_vm2, %v2011_v39  ;;  %2919 = vmatprep.subr.bf16.mxu1 %v3354_v0 }
 0xdb5   : > { %2914 = vmatpush3.bf16.xpose.msra.mxu0 %v2174_v40  ;;  %2915 = vmatprep.mubr.msk.bf16.mxu0 %vm3355_vm0, %v3354_v0 }
 0xdb6   : > { %2925 = vmatprep.subr.bf16.mxu0 %v3354_v0 }
 0xdba   : > { %2910 = vmatmul.mubr.msk.bf16.vlgmr.msra.gmra.mrb[60].mxu1 %vm386_vm2, %v2117_v23 }
 0xdbb   : > { %2921 = vmatprep.mubr.msk.bf16.mxu1 %vm3355_vm0, %v3354_v0 }
 0xdbc   : > { %2916 = vmatmul.mubr.msk.bf16.vlgmr.msra.gmra.mrb[64].mxu0 %vm386_vm2, %v2167_v42 }
 0xdbd   : > { %2927 = vmatprep.mubr.msk.bf16.mxu0 %vm3355_vm0, %v3354_v0 }
 0xe85   : > { %v4015_v43 = vpop.f32.mrb[56].mxu1 }
 0xe86   : > { %v2899_v44 = vpop.f32.mrb[57].mxu1 }
 0xe87   : > { %v2057_v46 = vpop.f32.mrb[58].mxu1  ;;  %v4017_v47 = vpop.f32.mrb[60].mxu0 }
 0xe88   : > { %v2900_v48 = vpop.f32.mrb[59].mxu1  ;;  %v2905_v49 = vpop.f32.mrb[61].mxu0 }
 0xe89   : > { %v2105_v50 = vpop.f32.mrb[62].mxu0  ;;  %v3058_v48 = vld [vmem:[#allocation8 + $0x10] sm:$0xff]   ;;  %v3059_v49 = vld [vmem:[#allocation8 + $0x18] sm:$0xff]  }
 0xe8a   : > { %v2906_v51 = vpop.f32.mrb[63].mxu0 }
 0xe8d   : > { %v2160_v41 = vpop.f32.mrb[60].mxu1 }
 0xe8e   : > { %v2911_v52 = vpop.f32.mrb[61].mxu1  ;;  %v2216_v54 = vsel %vm386_vm2, %v2160_v41, -inf }
 0xe8f   : > { %2217 = vmax.xlane.f32.xlu1 %v2216_v54  ;;  %v2163_v56 = vpop.f32.mrb[62].mxu1  ;;  %v2210_v58 = vpop.f32.mrb[64].mxu0 }
 0xe90   : > { %v2912_v59 = vpop.f32.mrb[63].mxu1  ;;  %v2917_v60 = vpop.f32.mrb[65].mxu0  ;;  %v2219_v61 = vsel %vm386_vm2, %v2210_v58, -inf }
 0xe91   : > { %2220 = vmax.xlane.f32.xlu0 %v2219_v61  ;;  %v2213_v62 = vpop.f32.mrb[66].mxu0 }
 0xe92   : > { %v2918_v63 = vpop.f32.mrb[67].mxu0 }
 0xea0   : > { %2286 = vrot.lane.b32.xlu1 %v3862_v18, %s3366_s16 }
 0xea7   : > { %2238 = vrot.lane.b32.xlu0 %v3860_v36, %s3366_s16  ;;  %s3270_s16 = sshll.u32 %s3371_s22, 4  ;;  %s3271_s16 = int_to_ptr.vmem [resolvable:$false] %s3270_s16 }
 0xea8   : > { %p3273_p12 = scmp.lt.s32.totalorder %s4066_s27, %s3271_s16 }
 0xec4   : > { %1777 = vadd.xlane.f32.xlu1 %v1776_v1  ;;  %v2621_v1 = vld [vmem:[#allocation11 + $0x1] ss:$0 sm:$0xff] }
 0xec6   : > { %1780 = vadd.xlane.f32.xlu0 %v1779_v2 }
 0xec8   : > { %2006 = vadd.xlane.f32.xlu1 %v2005_v3 }
 0xeca   : > { %2003 = vadd.xlane.f32.xlu0 %v2002_v6 }
 0xf1c   : > { %v2218_v7 = vpop.xlane.xlu1 %2217 }
 0xf1d   : > { %v2222_v9 = vsub.f32 %v2160_v41, %v2218_v7 }
 0xf1e   : > { %v2221_v18 = vpop.xlane.xlu0 %2220 }
 0xf1f   : > { %v2224_v31 = vmul.f32 1.442695, %v2222_v9  ;;  %v2223_v35 = vsub.f32 %v2210_v58, %v2221_v18 }
 0xf20   : > { %v2287_v36 = vpop.permute.xlu1 %2286 }
 0xf21   : > { %3104 = vpow2.f32 %v2224_v31  ;;  %v2226_v10 = vmul.f32 1.442695, %v2223_v35  ;;  %v2292_v55 = vsel %vm508_vm3, %v2287_v36, 0 }
 0xf22   : > { %2926 = vmatpush3.bf16.msra.mxu0 %v2292_v55  ;;  %v2239_v11 = vpop.permute.xlu0 %2238 }
 0xf23   : > { %3106 = vpow2.f32 %v2226_v10  ;;  %v2244_v45 = vsel %vm508_vm3, %v2239_v11, 0 }
 0xf24   : > { %2920 = vmatpush3.bf16.msra.mxu1 %v2244_v45 }
 0xf25   : > { %2931 = vmatprep.subr.bf16.mxu1 %v3354_v0 }
 0xf2b   : > { %v3105_v12 = vpop.eup %3104 }
 0xf2c   : > { %v2228_v15 = vsel %vm386_vm2, %v3105_v12, 0.0  ;;  %v2236_v17 = vpack.c.bf16 %v3105_v12, %v3105_v12 }
 0xf2d   : > { %v3107_v19 = vpop.eup %3106  ;;  %2229 = vadd.xlane.f32.xlu0 %v2228_v15 }
 0xf2e   : > { %2922 = vmatmul.mubr.msk.bf16.vlgmr.msra.gmra.mrb[64].mxu1 %vm386_vm2, %v2236_v17  ;;  %v2231_v57 = vsel %vm386_vm2, %v3107_v19, 0.0  ;;  %v2237_v20 = vpack.c.bf16 %v3107_v19, %v3107_v19 }
 0xf2f   : > { %2232 = vadd.xlane.f32.xlu1 %v2231_v57  ;;  %2935 = vmatprep.mubr.msk.bf16.mxu1 %vm3355_vm0, %v3354_v0 }
 0xf30   : > { %2928 = vmatmul.mubr.msk.bf16.vlgmr.msra.gmra.mrb[68].mxu0 %vm386_vm2, %v2237_v20  ;;  %2932 = vmatpush3.bf16.msra.mxu1 %v3058_v48 }
 0xf31   : > { %1555 = vadd.xlane.f32.xlu0 %v1554_v21  ;;  %2933 = vmatprep.subr.bf16.mxu1 %v3354_v0 }
 0xf33   : > { %1558 = vadd.xlane.f32.xlu1 %v1557_v22 }
 0xf34   : > { %2934 = vmatpush3.bf16.msra.mxu1 %v3059_v49 }
 0xf51   : > { %v1778_v24 = vpop.xlane.xlu1 %1777 }
 0xf52   : > { %3108 = vrcp.f32 %v1778_v24 }
 0xf53   : > { %v1781_v25 = vpop.xlane.xlu0 %1780 }
 0xf54   : > { %3110 = vrcp.f32 %v1781_v25 }
 0xf55   : > { %v2007_v26 = vpop.xlane.xlu1 %2006 }
 0xf56   : > { %3112 = vrcp.f32 %v2007_v26 }
 0xf57   : > { %v2004_v27 = vpop.xlane.xlu0 %2003 }
 0xf58   : > { %3114 = vrcp.f32 %v2004_v27 }
 0xf5c   : > { %v3109_v29 = vpop.eup %3108 }
 0xf5d   : > { %v1882_v33 = vmul.f32 %v3109_v29, %v3985_v4 }
 0xf5e   : > { %v3111_v30 = vpop.eup %3110 }
 0xf5f   : > { %v1883_v14 = vmul.f32 %v3111_v30, %v3987_v8 }
 0xf60   : > { %v3113_v16 = vpop.eup %3112 }
 0xf61   : > { %v1884_v34 = vpack.c.bf16 %v1883_v14, %v1882_v33  ;;  %v2109_v37 = vmul.f32 %v3113_v16, %v4017_v47 }
 0xf62   : > { %v3115_v13 = vpop.eup %3114 }
 0xf63   : > { %1886 = vrot.lane.b32.xlu0 %v1884_v34, %s3368_s13  ;;  %v2108_v53 = vmul.f32 %v3115_v13, %v4015_v43 }
 0xf65   : > { %v2110_v5 = vpack.c.bf16 %v2109_v37, %v2108_v53 }
 0xf67   : > { %2112 = vrot.lane.b32.xlu1 %v2110_v5, %s3367_s12  ;;  %s3272_s12 = scalar_lea.vmem %s3271_s16, 256 }
 0xf68   : > { %p3274_p1 = scmp.lt.s32.totalorder %s3272_s12, %s3266_s7 }
 0xf6a   : > { %p3275_p2 = por %p3274_p1, %p3273_p12 }
 0xf6c   : > { %p3276_p13 = pnand %p3275_p2, %p3269_p7 }
 0xfba   : > { %v2230_v38 = vpop.xlane.xlu0 %2229 }
 0xfbc   : > { %v2233_v39 = vpop.xlane.xlu1 %2232 }
 0xfbe   : > { %v1556_v40 = vpop.xlane.xlu0 %1555 }
 0xfbf   : > { %3116 = vrcp.f32 %v1556_v40 }
 0xfc0   : > { %v1559_v23 = vpop.xlane.xlu1 %1558 }
 0xfc1   : > { %3118 = vrcp.f32 %v1559_v23 }
 0xfc2   : > { %3120 = vrcp.f32 %v2230_v38 }
 0xfc3   : > { %3122 = vrcp.f32 %v2233_v39 }
 0xfc9   : > { %v3117_v4 = vpop.eup %3116 }
 0xfca   : > { %v1660_v42 = vmul.f32 %v3117_v4, %v3939_v28 }
 0xfcb   : > { %v3119_v8 = vpop.eup %3118 }
 0xfcc   : > { %v1661_v44 = vmul.f32 %v3119_v8, %v3941_v32  ;;  %v3121_v28 = vpop.eup %3120 }
 0xfcd   : > { %v3123_v51 = vpop.eup %3122 }
 0xfce   : > { %v1662_v46 = vpack.c.bf16 %v1661_v44, %v1660_v42 }
 0xfd0   : > { %1663 = vst.msk [vmem:[#allocation2] sm:$0xff] %vm386_vm2, %v1662_v46 }
 0xfd5   : > { %v1887_v43 = vpop.permute.xlu0 %1886 }
 0xfd6   : > { %1889 = vst.msk [vmem:[#allocation2] sm:$0xff] %vm829_vm4, %v1887_v43 }
 0xfd9   : > { %v2113_v47 = vpop.permute.xlu1 %2112 }
 0xfda   : > { %2115 = vst.msk [vmem:[#allocation2] sm:$0xff] %vm1056_vm5, %v2113_v47 }
0x1001   : > { %v2280_v50 = vpop.f32.mrb[64].mxu1 }
0x1002   : > { %v2923_v32 = vpop.f32.mrb[65].mxu1  ;;  %v2334_v54 = vmul.f32 %v3121_v28, %v2280_v50 }
0x1003   : > { %v2283_v41 = vpop.f32.mrb[66].mxu1  ;;  %v2328_v52 = vpop.f32.mrb[68].mxu0 }
0x1004   : > { %v2335_v56 = vmul.f32 %v3123_v51, %v2328_v52  ;;  %v2924_v58 = vpop.f32.mrb[67].mxu1  ;;  %v2929_v59 = vpop.f32.mrb[69].mxu0 }
0x1005   : > { %v2331_v60 = vpop.f32.mrb[70].mxu0 }
0x1006   : > { %v2336_v61 = vpack.c.bf16 %v2335_v56, %v2334_v54  ;;  %v2930_v62 = vpop.f32.mrb[71].mxu0 }
0x1008   : > { %2338 = vrot.lane.b32.xlu1 %v2336_v61, %s3369_s14 }
0x107a   : > { %v2339_v63 = vpop.permute.xlu1 %2338 }
0x107b   : > { %2341 = vst.msk [vmem:[#allocation2] sm:$0xff] %vm1283_vm6, %v2339_v63 }
0x1082   : > { %v2342_v0 = vld [vmem:[#allocation2] sm:$0xff] }
0x1083   : > { %2936 = vmatmul.mubr.msk.bf16.vlgmr.msra.gmra.mrb[68].mxu1 %vm333_vm1, %v2342_v0 }
0x1156   : > { %v2405_v2 = vpop.f32.mrb[68].mxu1 }
0x1157   : > { %v2406_v3 = vadd.f32 %v2621_v1, %v2405_v2  ;;  %v2937_v6 = vpop.f32.mrb[69].mxu1 }
0x1158   : > { %v2408_v7 = vpop.f32.mrb[70].mxu1 }
0x1159   : > { %v2412_v9 = vmul.f32 0.5, %v2406_v3  ;;  %v2409_v18 = vadd.f32 %v2621_v1, %v2408_v7  ;;  %v2938_v31 = vpop.f32.mrb[71].mxu1 }
0x115b   : > { %v2637_v35 = vpack.c.bf16 %v2412_v9, %v2412_v9  ;;  %v2413_v36 = vmul.f32 0.5, %v2409_v18 }
0x115d   : > { %v2638_v10 = vpack.c.bf16 %v2413_v36, %v2413_v36  ;;  %2422 = vrot.lane.b32.xlu0 %v2637_v35, %s3370_s28 }
0x115f   : > { %2424 = vrot.lane.b32.xlu1 %v2638_v10, %s3370_s28 }
0x11cf   : > { %v2423_v55 = vpop.permute.xlu0 %2422 }
0x11d0   : > { %2429 = vst.msk [vmem:[%s3893_s24] sm:$0xf] %vm2428_vm8, %v2423_v55 }
0x11d1   : > { %v2425_v11 = vpop.permute.xlu1 %2424 }
0x11d2   : > { %2430 = vst.msk [vmem:[%s3893_s24 + $0x4] sm:$0xf] %vm2428_vm8, %v2425_v11 }
0x11d3   : > { %3279 = shalt.err (!%p3276_p13)
}
0x11d4   : > { %s3280_s13 = scalar_lea.hbm %s4064_s9, 128  ;;  %s3284_s24 = scalar_lea.hbm %s4118_s5, 256 }
0x11d5   : > { %p3281_p9 = scmp.ne.s32.totalorder %s4064_s9, %s3280_s13  ;;  %p3285_p11 = scmp.lt.u32.totalorder %s4064_s9, %s4118_s5 }
0x11d6   : > { %p3286_p4 = scmp.lt.u32.totalorder %s3284_s24, %s3280_s13  ;;  %p3288_p10 = scmp.lt.u32.totalorder %s3280_s13, %s4064_s9 }
0x11d7   : > { %p3282_p0 = pnand %p3281_p9, %p3582_p3 }
0x11d8   : > { %p3287_p8 = por %p3286_p4, %p3285_p11 }
0x11d9   : > { %p3283_p6 = pneg %p3282_p0 }
0x11da   : > { %p3289_p5 = por %p3288_p10, %p3287_p8 }
0x11dc   : > { %p3290_p7 = pnand %p3289_p5, %p3283_p6 }
0x11de   : > { %3293 = shalt.err (!%p3290_p7)
}
0x11df   : > { %s3372_s17 = smov 128   ;;  %s3373_s15 = smov 4  }
0x11e0   : > { %2957 = dma.vmem_to_hbm [thread:$0]  (%p3582_p3), %s4066_s27, 128, %s4064_s9, %s2432_s23, %s3357_s26, %s3372_s17, %s3373_s15  }
0x11e1 PF: > { %s2459_s7 = sand.u32 1, %s3328_s18   ;;  %p4138_p12 = scmp.ne.s32.totalorder %s4124_s25, 0 }
0x11e2   : > { %p4139_p1 = scmp.ge.s32.totalorder %s3340_s21, 2  ;;  %s2460_s22 = scalar_lea.sflag [#allocation5], %s2459_s7 }
0x11e4   : > { %p2977_p2 = pnand %p4139_p1, %p4138_p12 }
0x11e6   : > { %3323 = dma.done.wait (!%p2977_p2), %s2460_s22, 128  }
0x11e7   : > { %3325 = vsyncadd (!%p2977_p2), %s2460_s22, 4294967168  ;;  %p20_p13 = scmp.ge.s32.totalorder %s3569_s29, 4   ;;  %s4140_s18 = smov %s3332_s19 }
0x11e8   : > { %s4141_s19 = smov %s3336_s20  ;;  %s4142_s20 = smov %s3578_s8 }
0x11e9   : > { %s4143_s21 = smov %s3569_s29  ;;  %22 = sbr.rel (!%p20_p13) target bundleno = 7 (0x7), region = 105 }
0x11f0   :  { %2465 = vsyncpa [#allocation4], 1 }
0x11f1   :  { %2467 = vsyncpa [#allocation4 + $0x1], 1 }
0x11f2   :  { %2468 = vsyncpa [#allocation7], 1 }
0x11f3   :  { %2469 = vsyncpa [#allocation10], 1 }
0x11f4   :  { %2470 = vsyncpa [#allocation5], 1 }
0x11f5   :  { %2472 = vsyncpa [#allocation5 + $0x1], 1 }

</bundles_post_ra>
